<compile_context>
chip_gen: v7x
topology: tpu7x:2x2x1
jax: 0.10.0
libtpu: 0.0.40
codegen_flags: <defaults>
</compile_context>

<pallas_src>
import numpy as np
import jax
import jax.numpy as jnp
from jax.experimental import pallas as pl
from jax.experimental.pallas import tpu as pltpu

TEMPERATURE = 0.1          # unused by forward (kept for parity with __init__)
CONSISTENCY_WEIGHT = 1.0
TEMPORAL_WEIGHT = 0.5


def _round_up(a, b):
    return (a + b - 1) // b * b


def _sum_all(x):
    # Full reduction to a (1, 1) value: lane reduce first, then sublane reduce
    # (both single-axis reductions lower cleanly on Mosaic).
    return jnp.sum(jnp.sum(x, axis=-1, keepdims=True), axis=0, keepdims=True)


def _make_kernel(num_frames, d_orig, feat_is_f32, mxu_mode):
    inv_pairs = 1.0 / float(num_frames - 1)
    inv_d = 1.0 / float(d_orig)            # normalize by the ORIGINAL feature dim

    def kernel(idx_ref, feat_ref, cons_ref, temp_ref,
               g_buf, p_buf, scene_sum, counts,
               cons_acc, temp_acc, nvalid,
               pair_sq, pair_cnt, tmp_sq, tmp_cnt):
        phase = pl.program_id(0)           # 0: scene sums + consistency, 1: temporal
        f = pl.program_id(1)               # frame index
        c = pl.program_id(2)               # N-chunk index
        last_f = pl.num_programs(1) - 1
        last_c = pl.num_programs(2) - 1

        S = scene_sum.shape[0]
        TN = idx_ref.shape[-1]

        # ---- one-time init ----
        @pl.when((phase == 0) & (f == 0) & (c == 0))
        def _init():
            scene_sum[...] = jnp.zeros_like(scene_sum)
            counts[...] = jnp.zeros_like(counts)
            cons_acc[...] = jnp.zeros_like(cons_acc)
            temp_acc[...] = jnp.zeros_like(temp_acc)
            nvalid[...] = jnp.zeros_like(nvalid)
            cons_ref[...] = jnp.zeros_like(cons_ref)
            temp_ref[...] = jnp.zeros_like(temp_ref)

        # ---- phase 1 prologue: scene_sum -> scene_mean, once ----
        @pl.when((phase == 1) & (f == 0) & (c == 0))
        def _to_mean():
            inv = 1.0 / jnp.maximum(counts[...], 1.0)        # [S, 1] reciprocals
            scene_sum[...] = scene_sum[...] * inv            # not an [S, D] divide

        # ---- per-chunk assignment built in registers (no HBM one-hot) ----
        idx = idx_ref[...]                                   # [1, TN] int32
        scene_ids = jax.lax.broadcasted_iota(jnp.int32, (S, TN), 0)
        # idx == -1 (invalid or padding) never matches the non-negative iota.
        a32 = (scene_ids == idx).astype(jnp.float32)         # [S, TN]
        pc = jnp.sum(a32, axis=1, keepdims=True)             # [S, 1] presence
        x = feat_ref[...]                                    # [TN, D_pad]

        if mxu_mode == "f32":
            gc = jnp.dot(a32, x.astype(jnp.float32),
                         preferred_element_type=jnp.float32)
        elif mxu_mode == "bf16x2" and feat_is_f32:
            # hi + residual bf16 passes; A (0/1) is exact in bf16 and, with
            # unique per-frame indices, each output row is a pure selection.
            a_bf = a32.astype(jnp.bfloat16)
            x_hi = x.astype(jnp.bfloat16)
            x_lo = (x - x_hi.astype(jnp.float32)).astype(jnp.bfloat16)
            gc = (jnp.dot(a_bf, x_hi, preferred_element_type=jnp.float32)
                  + jnp.dot(a_bf, x_lo, preferred_element_type=jnp.float32))
        else:
            a_bf = a32.astype(jnp.bfloat16)
            gc = jnp.dot(a_bf, x.astype(jnp.bfloat16),
                         preferred_element_type=jnp.float32)

        slot = f % 2                       # 2-slot prev/cur frame buffer
        prev = 1 - slot

        # ================= phase 0 =================
        @pl.when(phase == 0)
        def _phase0():
            not_last = f < last_f

            # Build the current-frame scene buffer only when this frame will
            # serve as "prev" for the next one (skip the dead last-frame store).
            @pl.when(not_last & (c == 0))
            def _():
                g_buf[slot] = gc
                p_buf[slot] = pc

            @pl.when(not_last & (c > 0))
            def _():
                g_buf[slot] += gc
                p_buf[slot] += pc

            # Running scene sums: one [S, D] RMW per frame (from the buffer),
            # except the last frame which accumulates per chunk directly.
            @pl.when(not_last & (c == last_c))
            def _():
                scene_sum[...] += g_buf[slot]
                counts[...] += p_buf[slot]

            @pl.when(f == last_f)
            def _():
                scene_sum[...] += gc
                counts[...] += pc

            # Consecutive-frame consistency, accumulated per chunk against the
            # fully-built previous frame buffer.
            @pl.when(f > 0)
            def _pair():
                @pl.when(c == 0)
                def _():
                    pair_sq[...] = jnp.zeros_like(pair_sq)
                    pair_cnt[...] = jnp.zeros_like(pair_cnt)

                m = pc * p_buf[prev]                          # [S, 1] common mask
                d = gc - g_buf[prev]                          # [S, D]
                pair_sq[...] += _sum_all(m * (d * d))
                pair_cnt[...] += _sum_all(m)

                @pl.when(c == last_c)
                def _():
                    cnt = pair_cnt[...]
                    pair = jnp.where(
                        cnt > 0.0,
                        pair_sq[...] * inv_d / jnp.maximum(cnt, 1.0), 0.0)
                    cons_acc[...] += pair

        # ================= phase 1 =================
        @pl.when(phase == 1)
        def _phase1():
            @pl.when(c == 0)
            def _():
                tmp_sq[...] = jnp.zeros_like(tmp_sq)
                tmp_cnt[...] = jnp.zeros_like(tmp_cnt)

            d = gc - scene_sum[...]                           # scene_sum == mean now
            tmp_sq[...] += _sum_all(pc * (d * d))
            tmp_cnt[...] += _sum_all(pc)

            @pl.when(c == last_c)
            def _():
                nf = tmp_cnt[...]
                loss_f = jnp.where(
                    nf > 0.0, tmp_sq[...] * inv_d / jnp.maximum(nf, 1.0), 0.0)
                temp_acc[...] += loss_f
                nvalid[...] += (nf > 0.0).astype(jnp.float32)

            @pl.when((f == last_f) & (c == last_c))
            def _finalize():
                cons_ref[...] = cons_acc[...] * inv_pairs
                nv = nvalid[...]
                temp_ref[...] = jnp.where(
                    nv > 0.0, temp_acc[...] / jnp.maximum(nv, 1.0), 0.0)

    return kernel


def _vmem_capacity_bytes():
    try:
        return int(pltpu.get_tpu_info().vmem_capacity_bytes)
    except Exception:
        return 64 << 20    # conservative fallback (v7x-sized)


def cross_frame_consistency_loss(point_features, visibility_matrix, point_indices,
                                 consistency_weight=CONSISTENCY_WEIGHT,
                                 temporal_weight=TEMPORAL_WEIGHT,
                                 mxu_mode="bf16x2"):
    """JAX/Pallas forward of CrossFrameConsistencyLoss.

    mxu_mode:
      "bf16x2" (default): feats stream in their input dtype; the scatter matmul
          runs as two bf16 MXU passes (hi + residual) with f32 accumulation.
      "bf16": stream and multiply in bf16 (halves HBM traffic, ~1e-3 rounding).
      "f32": exact f32 matmul (slowest on v5e/v6e).

    NOTE: scene indices must be unique within a frame (the PyTorch
    intersect1d/searchsorted alignment implicitly assumes the same).
    """
    num_frames, N, D = point_features.shape
    S = visibility_matrix.shape[0]        # visibility only contributes its shape

    if num_frames < 2:
        z = jnp.float32(0.0)
        return {'consistency_loss': z, 'temporal_smoothness_loss': z,
                'total_loss': z}

    # ---- dtype streaming (review: don't force f32 through HBM) ----
    feats = point_features
    if mxu_mode == "bf16":
        feats = feats.astype(jnp.bfloat16)
    elif feats.dtype != jnp.bfloat16:
        feats = feats.astype(jnp.float32)
    feat_is_f32 = (feats.dtype == jnp.float32)
    fbytes = 2 if feats.dtype == jnp.bfloat16 else 4

    # ---- padding / N-tiling (lane-dense D, 8-aligned S, <=512-point chunks) ----
    S_pad = _round_up(max(S, 8), 8)
    D_pad = _round_up(max(D, 128), 128)   # TODO(synk): 256 multiple on v6e/v7x fills the 2x256^2 MXU better
    if N <= 512:
        TN = _round_up(max(N, 128), 128)
        N_pad = TN
    else:
        TN = 512
        N_pad = _round_up(N, TN)
    n_chunks = N_pad // TN

    idx2d = jnp.stack(point_indices).astype(jnp.int32)
    idx2d = jnp.pad(idx2d, ((0, 0), (0, N_pad - N)), constant_values=-1)
    idx = idx2d.reshape(num_frames, 1, N_pad)                 # [F, 1, N_pad]
    feats_p = jnp.pad(feats, ((0, 0), (0, N_pad - N), (0, D_pad - D)))

    # ---- generation-aware VMEM budget ----
    est = (4 * 3 * S_pad * D_pad                       # g_buf(2) + scene_sum
           + 4 * 3 * S_pad * 128                       # p_buf(2) + counts (lane padded)
           + 7 * 8 * 128 * 4                           # (1,1) scalar accumulators
           + 2 * 2 * (TN * D_pad * fbytes + TN * 4)    # double-buffered feat/idx blocks
           + 4 * 4 * S_pad * TN                        # in-kernel one-hot temporaries
           + (8 << 20))                                # headroom
    cap = _vmem_capacity_bytes()
    vmem_limit = int(min(max(32 << 20, est), max(32 << 20, cap - (16 << 20))))
    # TODO(synk): if est exceeds cap, fall back to S-tiling rather than clamping.

    kernel = _make_kernel(num_frames, D, feat_is_f32, mxu_mode)

    cons, temp = pl.pallas_call(
        kernel,
        out_shape=(jax.ShapeDtypeStruct((1, 1), jnp.float32),
                   jax.ShapeDtypeStruct((1, 1), jnp.float32)),
        grid_spec=pltpu.PrefetchScalarGridSpec(
            num_scalar_prefetch=0,
            grid=(2, num_frames, n_chunks),            # (phase, frame, chunk)
            in_specs=[pl.BlockSpec((None, 1, TN), lambda p, f, c: (f, 0, c)),
                      pl.BlockSpec((None, TN, D_pad), lambda p, f, c: (f, c, 0))],
            out_specs=[pl.BlockSpec((1, 1), lambda p, f, c: (0, 0)),
                       pl.BlockSpec((1, 1), lambda p, f, c: (0, 0))],
            scratch_shapes=[pltpu.VMEM((2, S_pad, D_pad), jnp.float32),  # prev/cur frame G
                            pltpu.VMEM((2, S_pad, 1), jnp.float32),     # prev/cur frame P
                            pltpu.VMEM((S_pad, D_pad), jnp.float32),    # scene_sum / mean
                            pltpu.VMEM((S_pad, 1), jnp.float32),        # counts
                            pltpu.VMEM((1, 1), jnp.float32),            # cons accum
                            pltpu.VMEM((1, 1), jnp.float32),            # temporal accum
                            pltpu.VMEM((1, 1), jnp.float32),            # valid-frame count
                            pltpu.VMEM((1, 1), jnp.float32),            # per-pair sq partial
                            pltpu.VMEM((1, 1), jnp.float32),            # per-pair cnt partial
                            pltpu.VMEM((1, 1), jnp.float32),            # per-frame sq partial
                            pltpu.VMEM((1, 1), jnp.float32)]),          # per-frame cnt partial
        compiler_params=pltpu.CompilerParams(
            dimension_semantics=("arbitrary", "arbitrary", "arbitrary"),
            vmem_limit_bytes=vmem_limit),
    )(idx, feats_p)

    consistency_loss = cons[0, 0]
    temporal_smoothness_loss = temp[0, 0]
    total_loss = (consistency_weight * consistency_loss
                  + temporal_weight * temporal_smoothness_loss)
    return {'consistency_loss': consistency_loss,
            'temporal_smoothness_loss': temporal_smoothness_loss,
            'total_loss': total_loss}


def _reference(feats, indices, S, cw, tw):
    """NumPy re-implementation of the PyTorch loop semantics (for checking)."""
    feats = np.asarray(feats, dtype=np.float64)
    indices = [np.asarray(i) for i in indices]
    F_, N, D = feats.shape

    cons_losses = []
    for i in range(F_ - 1):
        idx1, idx2 = indices[i], indices[i + 1]
        v1, v2 = idx1 >= 0, idx2 >= 0
        vi1, vi2 = idx1[v1], idx2[v2]
        vf1, vf2 = feats[i][v1], feats[i + 1][v2]
        if len(vi1) == 0 or len(vi2) == 0:
            cons_losses.append(0.0)
            continue
        common = np.intersect1d(vi1, vi2)
        if len(common) == 0:
            cons_losses.append(0.0)
            continue
        d1 = {int(s): vf1[j] for j, s in enumerate(vi1)}
        d2 = {int(s): vf2[j] for j, s in enumerate(vi2)}
        a = np.stack([d1[int(s)] for s in common])
        b = np.stack([d2[int(s)] for s in common])
        cons_losses.append(float(np.mean((a - b) ** 2)))
    cons = float(np.mean(cons_losses)) if cons_losses else 0.0

    scene = np.zeros((S, D))
    counts = np.zeros(S)
    for f in range(F_):
        for n in range(N):
            s = int(indices[f][n])
            if s >= 0:
                scene[s] += feats[f][n]
                counts[s] += 1
    nz = counts > 0
    scene[nz] /= counts[nz][:, None]

    t_losses = []
    for f in range(F_):
        vm = indices[f] >= 0
        if vm.sum() > 0:
            t_losses.append(
                float(np.mean((feats[f][vm] - scene[indices[f][vm]]) ** 2)))
    temp = float(np.mean(t_losses)) if t_losses else 0.0
    return cons, temp, cw * cons + tw * temp


if __name__ == "__main__":
    key = jax.random.PRNGKey(0)
    num_frames, N, feature_dim, total_scene_points = 4, 8, 32, 16

    kf, ki = jax.random.split(key)
    point_features = jax.random.normal(
        kf, (num_frames, N, feature_dim), dtype=jnp.float32)

    # Unique scene indices per frame; ~25% marked invalid (-1).
    point_indices = []
    for f in range(num_frames):
        kp, km = jax.random.split(jax.random.fold_in(ki, f))
        perm = jax.random.permutation(kp, total_scene_points)[:N]
        drop = jax.random.bernoulli(km, 0.25, (N,))
        point_indices.append(jnp.where(drop, -1, perm).astype(jnp.int32))

    visibility_matrix = jnp.zeros(
        (total_scene_points, num_frames), dtype=jnp.float32)  # only shape used

    out = cross_frame_consistency_loss(
        point_features, visibility_matrix, point_indices)
    jax.block_until_ready(out['total_loss'])

    ref_c, ref_t, ref_total = _reference(
        point_features, point_indices, total_scene_points,
        CONSISTENCY_WEIGHT, TEMPORAL_WEIGHT)
    np.testing.assert_allclose(float(out['consistency_loss']), ref_c,
                               rtol=2e-4, atol=1e-5)
    np.testing.assert_allclose(float(out['temporal_smoothness_loss']), ref_t,
                               rtol=2e-4, atol=1e-5)
    np.testing.assert_allclose(float(out['total_loss']), ref_total,
                               rtol=2e-4, atol=1e-5)

    print("KERNEL_OK")
</pallas_src>

<mosaic_0001>
module attributes {stable_mosaic.version = 11 : i64} {
  func.func @kernel(%arg0: i32, %arg1: i32, %arg2: i32, %arg3: memref<1x1x128xi32, #tpu.memory_space<vmem>>, %arg4: memref<1x128x128xf32, #tpu.memory_space<vmem>>, %arg5: memref<1x1xf32, #tpu.memory_space<vmem>>, %arg6: memref<1x1xf32, #tpu.memory_space<vmem>>, %arg7: memref<2x16x128xf32, #tpu.memory_space<vmem>>, %arg8: memref<2x16x1xf32, #tpu.memory_space<vmem>>, %arg9: memref<16x128xf32, #tpu.memory_space<vmem>>, %arg10: memref<16x1xf32, #tpu.memory_space<vmem>>, %arg11: memref<1x1xf32, #tpu.memory_space<vmem>>, %arg12: memref<1x1xf32, #tpu.memory_space<vmem>>, %arg13: memref<1x1xf32, #tpu.memory_space<vmem>>, %arg14: memref<1x1xf32, #tpu.memory_space<vmem>>, %arg15: memref<1x1xf32, #tpu.memory_space<vmem>>, %arg16: memref<1x1xf32, #tpu.memory_space<vmem>>, %arg17: memref<1x1xf32, #tpu.memory_space<vmem>>) attributes {dimension_semantics = [#tpu.dimension_semantics<arbitrary>, #tpu.dimension_semantics<arbitrary>, #tpu.dimension_semantics<arbitrary>], iteration_bounds = array<i64: 2, 4, 1>, scalar_prefetch = 0 : i64, scratch_operands = 11 : i64, tpu.core_type = #tpu.core_type<tc>, window_params = [{transform_indices = @transform_0, window_bounds = array<i64: 1, 1, 128>}, {transform_indices = @transform_1, window_bounds = array<i64: 1, 128, 128>}, {pipeline_mode = #tpu.pipeline_mode<synchronous>, transform_indices = @transform_2, window_bounds = array<i64: 1, 1>}, {pipeline_mode = #tpu.pipeline_mode<synchronous>, transform_indices = @transform_3, window_bounds = array<i64: 1, 1>}]} {
    %c0_i32 = arith.constant 0 : i32
    %0 = arith.cmpi eq, %arg0, %c0_i32 : i32
    %c0_i32_0 = arith.constant 0 : i32
    %1 = arith.cmpi eq, %arg1, %c0_i32_0 : i32
    %2 = arith.andi %0, %1 : i1
    %c0_i32_1 = arith.constant 0 : i32
    %3 = arith.cmpi eq, %arg2, %c0_i32_1 : i32
    %4 = arith.andi %2, %3 : i1
    %5 = arith.extui %4 : i1 to i32
    %c0_i32_2 = arith.constant 0 : i32
    %6 = arith.cmpi ne, %5, %c0_i32_2 : i32
    scf.if %6 {
      %cst_23 = arith.constant 0.000000e+00 : f32
      %50 = vector.broadcast %cst_23 : f32 to vector<16x128xf32>
      %c0_24 = arith.constant 0 : index
      %c0_25 = arith.constant 0 : index
      %51 = vector.load %arg9[%c0_24, %c0_25] : memref<16x128xf32, #tpu.memory_space<vmem>>, vector<16x128xf32>
      tpu.vector_store %arg9[%c0_24, %c0_25], %50 {strides = array<i32>} : memref<16x128xf32, #tpu.memory_space<vmem>>, vector<16x128xf32>,
      %cst_26 = arith.constant 0.000000e+00 : f32
      %52 = vector.broadcast %cst_26 : f32 to vector<16x1xf32>
      %c0_27 = arith.constant 0 : index
      %c0_28 = arith.constant 0 : index
      %53 = vector.load %arg10[%c0_27, %c0_28] : memref<16x1xf32, #tpu.memory_space<vmem>>, vector<16x1xf32>
      tpu.vector_store %arg10[%c0_27, %c0_28], %52 {strides = array<i32>} : memref<16x1xf32, #tpu.memory_space<vmem>>, vector<16x1xf32>,
      %cst_29 = arith.constant 0.000000e+00 : f32
      %54 = vector.broadcast %cst_29 : f32 to vector<1x1xf32>
      %c0_30 = arith.constant 0 : index
      %c0_31 = arith.constant 0 : index
      %55 = vector.load %arg11[%c0_30, %c0_31] : memref<1x1xf32, #tpu.memory_space<vmem>>, vector<1x1xf32>
      tpu.vector_store %arg11[%c0_30, %c0_31], %54 {strides = array<i32>} : memref<1x1xf32, #tpu.memory_space<vmem>>, vector<1x1xf32>,
      %cst_32 = arith.constant 0.000000e+00 : f32
      %56 = vector.broadcast %cst_32 : f32 to vector<1x1xf32>
      %c0_33 = arith.constant 0 : index
      %c0_34 = arith.constant 0 : index
      %57 = vector.load %arg12[%c0_33, %c0_34] : memref<1x1xf32, #tpu.memory_space<vmem>>, vector<1x1xf32>
      tpu.vector_store %arg12[%c0_33, %c0_34], %56 {strides = array<i32>} : memref<1x1xf32, #tpu.memory_space<vmem>>, vector<1x1xf32>,
      %cst_35 = arith.constant 0.000000e+00 : f32
      %58 = vector.broadcast %cst_35 : f32 to vector<1x1xf32>
      %c0_36 = arith.constant 0 : index
      %c0_37 = arith.constant 0 : index
      %59 = vector.load %arg13[%c0_36, %c0_37] : memref<1x1xf32, #tpu.memory_space<vmem>>, vector<1x1xf32>
      tpu.vector_store %arg13[%c0_36, %c0_37], %58 {strides = array<i32>} : memref<1x1xf32, #tpu.memory_space<vmem>>, vector<1x1xf32>,
      %cst_38 = arith.constant 0.000000e+00 : f32
      %60 = vector.broadcast %cst_38 : f32 to vector<1x1xf32>
      %c0_39 = arith.constant 0 : index
      %c0_40 = arith.constant 0 : index
      %61 = vector.load %arg5[%c0_39, %c0_40] : memref<1x1xf32, #tpu.memory_space<vmem>>, vector<1x1xf32>
      tpu.vector_store %arg5[%c0_39, %c0_40], %60 {strides = array<i32>} : memref<1x1xf32, #tpu.memory_space<vmem>>, vector<1x1xf32>,
      %cst_41 = arith.constant 0.000000e+00 : f32
      %62 = vector.broadcast %cst_41 : f32 to vector<1x1xf32>
      %c0_42 = arith.constant 0 : index
      %c0_43 = arith.constant 0 : index
      %63 = vector.load %arg6[%c0_42, %c0_43] : memref<1x1xf32, #tpu.memory_space<vmem>>, vector<1x1xf32>
      tpu.vector_store %arg6[%c0_42, %c0_43], %62 {strides = array<i32>} : memref<1x1xf32, #tpu.memory_space<vmem>>, vector<1x1xf32>,
    } else {
    }
    %c1_i32 = arith.constant 1 : i32
    %7 = arith.cmpi eq, %arg0, %c1_i32 : i32
    %c0_i32_3 = arith.constant 0 : i32
    %8 = arith.cmpi eq, %arg1, %c0_i32_3 : i32
    %9 = arith.andi %7, %8 : i1
    %c0_i32_4 = arith.constant 0 : i32
    %10 = arith.cmpi eq, %arg2, %c0_i32_4 : i32
    %11 = arith.andi %9, %10 : i1
    %12 = arith.extui %11 : i1 to i32
    %c0_i32_5 = arith.constant 0 : i32
    %13 = arith.cmpi ne, %12, %c0_i32_5 : i32
    scf.if %13 {
      %c0_23 = arith.constant 0 : index
      %c0_24 = arith.constant 0 : index
      %50 = vector.load %arg10[%c0_23, %c0_24] : memref<16x1xf32, #tpu.memory_space<vmem>>, vector<16x1xf32>
      %cst_25 = arith.constant 1.000000e+00 : f32
      %51 = vector.broadcast %cst_25 : f32 to vector<16x1xf32>
      %52 = arith.maximumf %50, %51 : vector<16x1xf32>
      %cst_26 = arith.constant 1.000000e+00 : f32
      %53 = vector.broadcast %cst_26 : f32 to vector<16x1xf32>
      %54 = arith.divf %53, %52 : vector<16x1xf32>
      %c0_27 = arith.constant 0 : index
      %c0_28 = arith.constant 0 : index
      %55 = vector.load %arg9[%c0_27, %c0_28] : memref<16x128xf32, #tpu.memory_space<vmem>>, vector<16x128xf32>
      %56 = vector.broadcast %54 : vector<16x1xf32> to vector<16x128xf32>
      %57 = arith.mulf %55, %56 : vector<16x128xf32>
      %c0_29 = arith.constant 0 : index
      %c0_30 = arith.constant 0 : index
      %58 = vector.load %arg9[%c0_29, %c0_30] : memref<16x128xf32, #tpu.memory_space<vmem>>, vector<16x128xf32>
      tpu.vector_store %arg9[%c0_29, %c0_30], %57 {strides = array<i32>} : memref<16x128xf32, #tpu.memory_space<vmem>>, vector<16x128xf32>,
    } else {
    }
    %c0 = arith.constant 0 : index
    %c0_6 = arith.constant 0 : index
    %c0_7 = arith.constant 0 : index
    %14 = vector.load %arg3[%c0, %c0_6, %c0_7] : memref<1x1x128xi32, #tpu.memory_space<vmem>>, vector<1x1x128xi32>
    %15 = vector.shape_cast %14 : vector<1x1x128xi32> to vector<1x128xi32>
    %16 = tpu.iota {dimensions = array<i32: 0>} : vector<16x128xi32>
    %17 = vector.broadcast %15 : vector<1x128xi32> to vector<16x128xi32>
    %18 = arith.cmpi eq, %16, %17 : vector<16x128xi32>
    %19 = arith.extui %18 : vector<16x128xi1> to vector<16x128xi32>
    %20 = arith.sitofp %19 : vector<16x128xi32> to vector<16x128xf32>
    %cst = arith.constant dense<0.000000e+00> : vector<16xf32>
    %21 = vector.multi_reduction <add>, %20, %cst [1] : vector<16x128xf32> to vector<16xf32>
    %22 = vector.shape_cast %21 : vector<16xf32> to vector<16x1xf32>
    %c0_8 = arith.constant 0 : index
    %c0_9 = arith.constant 0 : index
    %c0_10 = arith.constant 0 : index
    %23 = vector.load %arg4[%c0_8, %c0_9, %c0_10] : memref<1x128x128xf32, #tpu.memory_space<vmem>>, vector<1x128x128xf32>
    %24 = vector.shape_cast %23 : vector<1x128x128xf32> to vector<128x128xf32>
    %25 = arith.truncf %20 : vector<16x128xf32> to vector<16x128xbf16>
    %26 = arith.truncf %24 : vector<128x128xf32> to vector<128x128xbf16>
    %27 = arith.extf %26 : vector<128x128xbf16> to vector<128x128xf32>
    %28 = arith.subf %24, %27 : vector<128x128xf32>
    %29 = arith.truncf %28 : vector<128x128xf32> to vector<128x128xbf16>
    %cst_11 = arith.constant dense<0.000000e+00> : vector<16x128xf32>
    %30 = tpu.matmul %25, %26, %cst_11 {dimension_numbers = #tpu.dot_dimension_numbers<[1], [0], [0], [1], [0, 0, 1, 1], [], []>} : vector<16x128xbf16>, vector<128x128xbf16>, vector<16x128xf32> -> vector<16x128xf32>
    %cst_12 = arith.constant dense<0.000000e+00> : vector<16x128xf32>
    %31 = tpu.matmul %25, %29, %cst_12 {dimension_numbers = #tpu.dot_dimension_numbers<[1], [0], [0], [1], [0, 0, 1, 1], [], []>} : vector<16x128xbf16>, vector<128x128xbf16>, vector<16x128xf32> -> vector<16x128xf32>
    %32 = arith.addf %30, %31 : vector<16x128xf32>
    %c2_i32 = arith.constant 2 : i32
    %c0_i32_13 = arith.constant 0 : i32
    %33 = arith.cmpi eq, %c2_i32, %c0_i32_13 : i32
    %c1_i32_14 = arith.constant 1 : i32
    %34 = arith.select %33, %c1_i32_14, %c2_i32 : i32
    %35 = arith.remsi %arg1, %34 : i32
    %c0_i32_15 = arith.constant 0 : i32
    %36 = arith.cmpi ne, %35, %c0_i32_15 : i32
    %c0_i32_16 = arith.constant 0 : i32
    %37 = arith.cmpi slt, %35, %c0_i32_16 : i32
    %c0_i32_17 = arith.constant 0 : i32
    %38 = arith.cmpi slt, %34, %c0_i32_17 : i32
    %39 = arith.xori %37, %38 : i1
    %40 = arith.andi %39, %36 : i1
    %41 = arith.addi %35, %34 : i32
    %42 = arith.select %40, %41, %35 : i32
    %c1_i32_18 = arith.constant 1 : i32
    %43 = arith.subi %c1_i32_18, %42 : i32
    %c0_i32_19 = arith.constant 0 : i32
    %44 = arith.cmpi eq, %arg0, %c0_i32_19 : i32
    %45 = arith.extui %44 : i1 to i32
    %c0_i32_20 = arith.constant 0 : i32
    %46 = arith.cmpi ne, %45, %c0_i32_20 : i32
    scf.if %46 {
      %c3_i32 = arith.constant 3 : i32
      %50 = arith.cmpi slt, %arg1, %c3_i32 : i32
      %c0_i32_23 = arith.constant 0 : i32
      %51 = arith.cmpi eq, %arg2, %c0_i32_23 : i32
      %52 = arith.andi %50, %51 : i1
      %53 = arith.extui %52 : i1 to i32
      %c0_i32_24 = arith.constant 0 : i32
      %54 = arith.cmpi ne, %53, %c0_i32_24 : i32
      scf.if %54 {
        %69 = arith.index_cast %42 : i32 to index
        %c0_33 = arith.constant 0 : index
        %c0_34 = arith.constant 0 : index
        %70 = vector.load %arg7[%69, %c0_33, %c0_34] : memref<2x16x128xf32, #tpu.memory_space<vmem>>, vector<1x16x128xf32>
        %71 = vector.shape_cast %70 : vector<1x16x128xf32> to vector<16x128xf32>
        %72 = vector.shape_cast %32 : vector<16x128xf32> to vector<1x16x128xf32>
        tpu.vector_store %arg7[%69, %c0_33, %c0_34], %72 {strides = array<i32>} : memref<2x16x128xf32, #tpu.memory_space<vmem>>, vector<1x16x128xf32>,
        %73 = arith.index_cast %42 : i32 to index
        %c0_35 = arith.constant 0 : index
        %c0_36 = arith.constant 0 : index
        %74 = vector.load %arg8[%73, %c0_35, %c0_36] : memref<2x16x1xf32, #tpu.memory_space<vmem>>, vector<1x16x1xf32>
        %75 = vector.shape_cast %74 : vector<1x16x1xf32> to vector<16x1xf32>
        %76 = vector.shape_cast %22 : vector<16x1xf32> to vector<1x16x1xf32>
        tpu.vector_store %arg8[%73, %c0_35, %c0_36], %76 {strides = array<i32>} : memref<2x16x1xf32, #tpu.memory_space<vmem>>, vector<1x16x1xf32>,
      } else {
      }
      %c0_i32_25 = arith.constant 0 : i32
      %55 = arith.cmpi sgt, %arg2, %c0_i32_25 : i32
      %56 = arith.andi %50, %55 : i1
      %57 = arith.extui %56 : i1 to i32
      %c0_i32_26 = arith.constant 0 : i32
      %58 = arith.cmpi ne, %57, %c0_i32_26 : i32
      scf.if %58 {
        %69 = arith.index_cast %42 : i32 to index
        %c0_33 = arith.constant 0 : index
        %c0_34 = arith.constant 0 : index
        %70 = vector.load %arg7[%69, %c0_33, %c0_34] : memref<2x16x128xf32, #tpu.memory_space<vmem>>, vector<1x16x128xf32>
        %71 = vector.shape_cast %70 : vector<1x16x128xf32> to vector<16x128xf32>
        %72 = arith.addf %71, %32 : vector<16x128xf32>
        %73 = arith.index_cast %42 : i32 to index
        %c0_35 = arith.constant 0 : index
        %c0_36 = arith.constant 0 : index
        %74 = vector.load %arg7[%73, %c0_35, %c0_36] : memref<2x16x128xf32, #tpu.memory_space<vmem>>, vector<1x16x128xf32>
        %75 = vector.shape_cast %74 : vector<1x16x128xf32> to vector<16x128xf32>
        %76 = vector.shape_cast %72 : vector<16x128xf32> to vector<1x16x128xf32>
        tpu.vector_store %arg7[%73, %c0_35, %c0_36], %76 {strides = array<i32>} : memref<2x16x128xf32, #tpu.memory_space<vmem>>, vector<1x16x128xf32>,
        %77 = arith.index_cast %42 : i32 to index
        %c0_37 = arith.constant 0 : index
        %c0_38 = arith.constant 0 : index
        %78 = vector.load %arg8[%77, %c0_37, %c0_38] : memref<2x16x1xf32, #tpu.memory_space<vmem>>, vector<1x16x1xf32>
        %79 = vector.shape_cast %78 : vector<1x16x1xf32> to vector<16x1xf32>
        %80 = arith.addf %79, %22 : vector<16x1xf32>
        %81 = arith.index_cast %42 : i32 to index
        %c0_39 = arith.constant 0 : index
        %c0_40 = arith.constant 0 : index
        %82 = vector.load %arg8[%81, %c0_39, %c0_40] : memref<2x16x1xf32, #tpu.memory_space<vmem>>, vector<1x16x1xf32>
        %83 = vector.shape_cast %82 : vector<1x16x1xf32> to vector<16x1xf32>
        %84 = vector.shape_cast %80 : vector<16x1xf32> to vector<1x16x1xf32>
        tpu.vector_store %arg8[%81, %c0_39, %c0_40], %84 {strides = array<i32>} : memref<2x16x1xf32, #tpu.memory_space<vmem>>, vector<1x16x1xf32>,
      } else {
      }
      %c0_i32_27 = arith.constant 0 : i32
      %59 = arith.cmpi eq, %arg2, %c0_i32_27 : i32
      %60 = arith.andi %50, %59 : i1
      %61 = arith.extui %60 : i1 to i32
      %c0_i32_28 = arith.constant 0 : i32
      %62 = arith.cmpi ne, %61, %c0_i32_28 : i32
      scf.if %62 {
        %c0_33 = arith.constant 0 : index
        %c0_34 = arith.constant 0 : index
        %69 = vector.load %arg9[%c0_33, %c0_34] : memref<16x128xf32, #tpu.memory_space<vmem>>, vector<16x128xf32>
        %70 = arith.index_cast %42 : i32 to index
        %c0_35 = arith.constant 0 : index
        %c0_36 = arith.constant 0 : index
        %71 = vector.load %arg7[%70, %c0_35, %c0_36] : memref<2x16x128xf32, #tpu.memory_space<vmem>>, vector<1x16x128xf32>
        %72 = vector.shape_cast %71 : vector<1x16x128xf32> to vector<16x128xf32>
        %73 = arith.addf %69, %72 : vector<16x128xf32>
        %c0_37 = arith.constant 0 : index
        %c0_38 = arith.constant 0 : index
        %74 = vector.load %arg9[%c0_37, %c0_38] : memref<16x128xf32, #tpu.memory_space<vmem>>, vector<16x128xf32>
        tpu.vector_store %arg9[%c0_37, %c0_38], %73 {strides = array<i32>} : memref<16x128xf32, #tpu.memory_space<vmem>>, vector<16x128xf32>,
        %c0_39 = arith.constant 0 : index
        %c0_40 = arith.constant 0 : index
        %75 = vector.load %arg10[%c0_39, %c0_40] : memref<16x1xf32, #tpu.memory_space<vmem>>, vector<16x1xf32>
        %76 = arith.index_cast %42 : i32 to index
        %c0_41 = arith.constant 0 : index
        %c0_42 = arith.constant 0 : index
        %77 = vector.load %arg8[%76, %c0_41, %c0_42] : memref<2x16x1xf32, #tpu.memory_space<vmem>>, vector<1x16x1xf32>
        %78 = vector.shape_cast %77 : vector<1x16x1xf32> to vector<16x1xf32>
        %79 = arith.addf %75, %78 : vector<16x1xf32>
        %c0_43 = arith.constant 0 : index
        %c0_44 = arith.constant 0 : index
        %80 = vector.load %arg10[%c0_43, %c0_44] : memref<16x1xf32, #tpu.memory_space<vmem>>, vector<16x1xf32>
        tpu.vector_store %arg10[%c0_43, %c0_44], %79 {strides = array<i32>} : memref<16x1xf32, #tpu.memory_space<vmem>>, vector<16x1xf32>,
      } else {
      }
      %c3_i32_29 = arith.constant 3 : i32
      %63 = arith.cmpi eq, %arg1, %c3_i32_29 : i32
      %64 = arith.extui %63 : i1 to i32
      %c0_i32_30 = arith.constant 0 : i32
      %65 = arith.cmpi ne, %64, %c0_i32_30 : i32
      scf.if %65 {
        %c0_33 = arith.constant 0 : index
        %c0_34 = arith.constant 0 : index
        %69 = vector.load %arg9[%c0_33, %c0_34] : memref<16x128xf32, #tpu.memory_space<vmem>>, vector<16x128xf32>
        %70 = arith.addf %69, %32 : vector<16x128xf32>
        %c0_35 = arith.constant 0 : index
        %c0_36 = arith.constant 0 : index
        %71 = vector.load %arg9[%c0_35, %c0_36] : memref<16x128xf32, #tpu.memory_space<vmem>>, vector<16x128xf32>
        tpu.vector_store %arg9[%c0_35, %c0_36], %70 {strides = array<i32>} : memref<16x128xf32, #tpu.memory_space<vmem>>, vector<16x128xf32>,
        %c0_37 = arith.constant 0 : index
        %c0_38 = arith.constant 0 : index
        %72 = vector.load %arg10[%c0_37, %c0_38] : memref<16x1xf32, #tpu.memory_space<vmem>>, vector<16x1xf32>
        %73 = arith.addf %72, %22 : vector<16x1xf32>
        %c0_39 = arith.constant 0 : index
        %c0_40 = arith.constant 0 : index
        %74 = vector.load %arg10[%c0_39, %c0_40] : memref<16x1xf32, #tpu.memory_space<vmem>>, vector<16x1xf32>
        tpu.vector_store %arg10[%c0_39, %c0_40], %73 {strides = array<i32>} : memref<16x1xf32, #tpu.memory_space<vmem>>, vector<16x1xf32>,
      } else {
      }
      %c0_i32_31 = arith.constant 0 : i32
      %66 = arith.cmpi sgt, %arg1, %c0_i32_31 : i32
      %67 = arith.extui %66 : i1 to i32
      %c0_i32_32 = arith.constant 0 : i32
      %68 = arith.cmpi ne, %67, %c0_i32_32 : i32
      scf.if %68 {
        %c0_i32_33 = arith.constant 0 : i32
        %69 = arith.cmpi eq, %arg2, %c0_i32_33 : i32
        %70 = arith.extui %69 : i1 to i32
        %c0_i32_34 = arith.constant 0 : i32
        %71 = arith.cmpi ne, %70, %c0_i32_34 : i32
        scf.if %71 {
          %cst_53 = arith.constant 0.000000e+00 : f32
          %100 = vector.broadcast %cst_53 : f32 to vector<1x1xf32>
          %c0_54 = arith.constant 0 : index
          %c0_55 = arith.constant 0 : index
          %101 = vector.load %arg14[%c0_54, %c0_55] : memref<1x1xf32, #tpu.memory_space<vmem>>, vector<1x1xf32>
          tpu.vector_store %arg14[%c0_54, %c0_55], %100 {strides = array<i32>} : memref<1x1xf32, #tpu.memory_space<vmem>>, vector<1x1xf32>,
          %cst_56 = arith.constant 0.000000e+00 : f32
          %102 = vector.broadcast %cst_56 : f32 to vector<1x1xf32>
          %c0_57 = arith.constant 0 : index
          %c0_58 = arith.constant 0 : index
          %103 = vector.load %arg15[%c0_57, %c0_58] : memref<1x1xf32, #tpu.memory_space<vmem>>, vector<1x1xf32>
          tpu.vector_store %arg15[%c0_57, %c0_58], %102 {strides = array<i32>} : memref<1x1xf32, #tpu.memory_space<vmem>>, vector<1x1xf32>,
        } else {
        }
        %72 = arith.index_cast %43 : i32 to index
        %c0_35 = arith.constant 0 : index
        %c0_36 = arith.constant 0 : index
        %73 = vector.load %arg8[%72, %c0_35, %c0_36] : memref<2x16x1xf32, #tpu.memory_space<vmem>>, vector<1x16x1xf32>
        %74 = vector.shape_cast %73 : vector<1x16x1xf32> to vector<16x1xf32>
        %75 = arith.mulf %22, %74 : vector<16x1xf32>
        %76 = arith.index_cast %43 : i32 to index
        %c0_37 = arith.constant 0 : index
        %c0_38 = arith.constant 0 : index
        %77 = vector.load %arg7[%76, %c0_37, %c0_38] : memref<2x16x128xf32, #tpu.memory_space<vmem>>, vector<1x16x128xf32>
        %78 = vector.shape_cast %77 : vector<1x16x128xf32> to vector<16x128xf32>
        %79 = arith.subf %32, %78 : vector<16x128xf32>
        %c0_39 = arith.constant 0 : index
        %c0_40 = arith.constant 0 : index
        %80 = vector.load %arg14[%c0_39, %c0_40] : memref<1x1xf32, #tpu.memory_space<vmem>>, vector<1x1xf32>
        %81 = arith.mulf %79, %79 : vector<16x128xf32>
        %82 = vector.broadcast %75 : vector<16x1xf32> to vector<16x128xf32>
        %83 = arith.mulf %82, %81 : vector<16x128xf32>
        %cst_41 = arith.constant dense<0.000000e+00> : vector<16xf32>
        %84 = vector.multi_reduction <add>, %83, %cst_41 [1] : vector<16x128xf32> to vector<16xf32>
        %85 = vector.shape_cast %84 : vector<16xf32> to vector<16x1xf32>
        %cst_42 = arith.constant dense<0.000000e+00> : vector<1xf32>
        %86 = vector.multi_reduction <add>, %85, %cst_42 [0] : vector<16x1xf32> to vector<1xf32>
        %87 = vector.shape_cast %86 : vector<1xf32> to vector<1x1xf32>
        %88 = arith.addf %80, %87 : vector<1x1xf32>
        %c0_43 = arith.constant 0 : index
        %c0_44 = arith.constant 0 : index
        %89 = vector.load %arg14[%c0_43, %c0_44] : memref<1x1xf32, #tpu.memory_space<vmem>>, vector<1x1xf32>
        tpu.vector_store %arg14[%c0_43, %c0_44], %88 {strides = array<i32>} : memref<1x1xf32, #tpu.memory_space<vmem>>, vector<1x1xf32>,
        %c0_45 = arith.constant 0 : index
        %c0_46 = arith.constant 0 : index
        %90 = vector.load %arg15[%c0_45, %c0_46] : memref<1x1xf32, #tpu.memory_space<vmem>>, vector<1x1xf32>
        %cst_47 = arith.constant dense<0.000000e+00> : vector<16xf32>
        %91 = vector.multi_reduction <add>, %75, %cst_47 [1] : vector<16x1xf32> to vector<16xf32>
        %92 = vector.shape_cast %91 : vector<16xf32> to vector<16x1xf32>
        %cst_48 = arith.constant dense<0.000000e+00> : vector<1xf32>
        %93 = vector.multi_reduction <add>, %92, %cst_48 [0] : vector<16x1xf32> to vector<1xf32>
        %94 = vector.shape_cast %93 : vector<1xf32> to vector<1x1xf32>
        %95 = arith.addf %90, %94 : vector<1x1xf32>
        %c0_49 = arith.constant 0 : index
        %c0_50 = arith.constant 0 : index
        %96 = vector.load %arg15[%c0_49, %c0_50] : memref<1x1xf32, #tpu.memory_space<vmem>>, vector<1x1xf32>
        tpu.vector_store %arg15[%c0_49, %c0_50], %95 {strides = array<i32>} : memref<1x1xf32, #tpu.memory_space<vmem>>, vector<1x1xf32>,
        %c0_i32_51 = arith.constant 0 : i32
        %97 = arith.cmpi eq, %arg2, %c0_i32_51 : i32
        %98 = arith.extui %97 : i1 to i32
        %c0_i32_52 = arith.constant 0 : i32
        %99 = arith.cmpi ne, %98, %c0_i32_52 : i32
        scf.if %99 {
          %c0_53 = arith.constant 0 : index
          %c0_54 = arith.constant 0 : index
          %100 = vector.load %arg15[%c0_53, %c0_54] : memref<1x1xf32, #tpu.memory_space<vmem>>, vector<1x1xf32>
          %cst_55 = arith.constant 0.000000e+00 : f32
          %101 = vector.broadcast %cst_55 : f32 to vector<1x1xf32>
          %102 = arith.cmpf ogt, %100, %101 : vector<1x1xf32>
          %c0_56 = arith.constant 0 : index
          %c0_57 = arith.constant 0 : index
          %103 = vector.load %arg14[%c0_56, %c0_57] : memref<1x1xf32, #tpu.memory_space<vmem>>, vector<1x1xf32>
          %cst_58 = arith.constant 3.125000e-02 : f32
          %104 = vector.broadcast %cst_58 : f32 to vector<1x1xf32>
          %105 = arith.mulf %103, %104 : vector<1x1xf32>
          %cst_59 = arith.constant 1.000000e+00 : f32
          %106 = vector.broadcast %cst_59 : f32 to vector<1x1xf32>
          %107 = arith.maximumf %100, %106 : vector<1x1xf32>
          %108 = arith.divf %105, %107 : vector<1x1xf32>
          %cst_60 = arith.constant 0.000000e+00 : f32
          %109 = vector.broadcast %cst_60 : f32 to vector<1x1xf32>
          %110 = arith.select %102, %108, %109 : vector<1x1xi1>, vector<1x1xf32>
          %c0_61 = arith.constant 0 : index
          %c0_62 = arith.constant 0 : index
          %111 = vector.load %arg11[%c0_61, %c0_62] : memref<1x1xf32, #tpu.memory_space<vmem>>, vector<1x1xf32>
          %112 = arith.addf %111, %110 : vector<1x1xf32>
          %c0_63 = arith.constant 0 : index
          %c0_64 = arith.constant 0 : index
          %113 = vector.load %arg11[%c0_63, %c0_64] : memref<1x1xf32, #tpu.memory_space<vmem>>, vector<1x1xf32>
          tpu.vector_store %arg11[%c0_63, %c0_64], %112 {strides = array<i32>} : memref<1x1xf32, #tpu.memory_space<vmem>>, vector<1x1xf32>,
        } else {
        }
      } else {
      }
    } else {
    }
    %c1_i32_21 = arith.constant 1 : i32
    %47 = arith.cmpi eq, %arg0, %c1_i32_21 : i32
    %48 = arith.extui %47 : i1 to i32
    %c0_i32_22 = arith.constant 0 : i32
    %49 = arith.cmpi ne, %48, %c0_i32_22 : i32
    scf.if %49 {
      %c0_i32_23 = arith.constant 0 : i32
      %50 = arith.cmpi eq, %arg2, %c0_i32_23 : i32
      %51 = arith.extui %50 : i1 to i32
      %c0_i32_24 = arith.constant 0 : i32
      %52 = arith.cmpi ne, %51, %c0_i32_24 : i32
      scf.if %52 {
        %cst_43 = arith.constant 0.000000e+00 : f32
        %80 = vector.broadcast %cst_43 : f32 to vector<1x1xf32>
        %c0_44 = arith.constant 0 : index
        %c0_45 = arith.constant 0 : index
        %81 = vector.load %arg16[%c0_44, %c0_45] : memref<1x1xf32, #tpu.memory_space<vmem>>, vector<1x1xf32>
        tpu.vector_store %arg16[%c0_44, %c0_45], %80 {strides = array<i32>} : memref<1x1xf32, #tpu.memory_space<vmem>>, vector<1x1xf32>,
        %cst_46 = arith.constant 0.000000e+00 : f32
        %82 = vector.broadcast %cst_46 : f32 to vector<1x1xf32>
        %c0_47 = arith.constant 0 : index
        %c0_48 = arith.constant 0 : index
        %83 = vector.load %arg17[%c0_47, %c0_48] : memref<1x1xf32, #tpu.memory_space<vmem>>, vector<1x1xf32>
        tpu.vector_store %arg17[%c0_47, %c0_48], %82 {strides = array<i32>} : memref<1x1xf32, #tpu.memory_space<vmem>>, vector<1x1xf32>,
      } else {
      }
      %c0_25 = arith.constant 0 : index
      %c0_26 = arith.constant 0 : index
      %53 = vector.load %arg9[%c0_25, %c0_26] : memref<16x128xf32, #tpu.memory_space<vmem>>, vector<16x128xf32>
      %54 = arith.subf %32, %53 : vector<16x128xf32>
      %c0_27 = arith.constant 0 : index
      %c0_28 = arith.constant 0 : index
      %55 = vector.load %arg16[%c0_27, %c0_28] : memref<1x1xf32, #tpu.memory_space<vmem>>, vector<1x1xf32>
      %56 = arith.mulf %54, %54 : vector<16x128xf32>
      %57 = vector.broadcast %22 : vector<16x1xf32> to vector<16x128xf32>
      %58 = arith.mulf %57, %56 : vector<16x128xf32>
      %cst_29 = arith.constant dense<0.000000e+00> : vector<16xf32>
      %59 = vector.multi_reduction <add>, %58, %cst_29 [1] : vector<16x128xf32> to vector<16xf32>
      %60 = vector.shape_cast %59 : vector<16xf32> to vector<16x1xf32>
      %cst_30 = arith.constant dense<0.000000e+00> : vector<1xf32>
      %61 = vector.multi_reduction <add>, %60, %cst_30 [0] : vector<16x1xf32> to vector<1xf32>
      %62 = vector.shape_cast %61 : vector<1xf32> to vector<1x1xf32>
      %63 = arith.addf %55, %62 : vector<1x1xf32>
      %c0_31 = arith.constant 0 : index
      %c0_32 = arith.constant 0 : index
      %64 = vector.load %arg16[%c0_31, %c0_32] : memref<1x1xf32, #tpu.memory_space<vmem>>, vector<1x1xf32>
      tpu.vector_store %arg16[%c0_31, %c0_32], %63 {strides = array<i32>} : memref<1x1xf32, #tpu.memory_space<vmem>>, vector<1x1xf32>,
      %c0_33 = arith.constant 0 : index
      %c0_34 = arith.constant 0 : index
      %65 = vector.load %arg17[%c0_33, %c0_34] : memref<1x1xf32, #tpu.memory_space<vmem>>, vector<1x1xf32>
      %cst_35 = arith.constant dense<0.000000e+00> : vector<16xf32>
      %66 = vector.multi_reduction <add>, %22, %cst_35 [1] : vector<16x1xf32> to vector<16xf32>
      %67 = vector.shape_cast %66 : vector<16xf32> to vector<16x1xf32>
      %cst_36 = arith.constant dense<0.000000e+00> : vector<1xf32>
      %68 = vector.multi_reduction <add>, %67, %cst_36 [0] : vector<16x1xf32> to vector<1xf32>
      %69 = vector.shape_cast %68 : vector<1xf32> to vector<1x1xf32>
      %70 = arith.addf %65, %69 : vector<1x1xf32>
      %c0_37 = arith.constant 0 : index
      %c0_38 = arith.constant 0 : index
      %71 = vector.load %arg17[%c0_37, %c0_38] : memref<1x1xf32, #tpu.memory_space<vmem>>, vector<1x1xf32>
      tpu.vector_store %arg17[%c0_37, %c0_38], %70 {strides = array<i32>} : memref<1x1xf32, #tpu.memory_space<vmem>>, vector<1x1xf32>,
      %c0_i32_39 = arith.constant 0 : i32
      %72 = arith.cmpi eq, %arg2, %c0_i32_39 : i32
      %73 = arith.extui %72 : i1 to i32
      %c0_i32_40 = arith.constant 0 : i32
      %74 = arith.cmpi ne, %73, %c0_i32_40 : i32
      scf.if %74 {
        %c0_43 = arith.constant 0 : index
        %c0_44 = arith.constant 0 : index
        %80 = vector.load %arg17[%c0_43, %c0_44] : memref<1x1xf32, #tpu.memory_space<vmem>>, vector<1x1xf32>
        %cst_45 = arith.constant 0.000000e+00 : f32
        %81 = vector.broadcast %cst_45 : f32 to vector<1x1xf32>
        %82 = arith.cmpf ogt, %80, %81 : vector<1x1xf32>
        %c0_46 = arith.constant 0 : index
        %c0_47 = arith.constant 0 : index
        %83 = vector.load %arg16[%c0_46, %c0_47] : memref<1x1xf32, #tpu.memory_space<vmem>>, vector<1x1xf32>
        %cst_48 = arith.constant 3.125000e-02 : f32
        %84 = vector.broadcast %cst_48 : f32 to vector<1x1xf32>
        %85 = arith.mulf %83, %84 : vector<1x1xf32>
        %cst_49 = arith.constant 1.000000e+00 : f32
        %86 = vector.broadcast %cst_49 : f32 to vector<1x1xf32>
        %87 = arith.maximumf %80, %86 : vector<1x1xf32>
        %88 = arith.divf %85, %87 : vector<1x1xf32>
        %cst_50 = arith.constant 0.000000e+00 : f32
        %89 = vector.broadcast %cst_50 : f32 to vector<1x1xf32>
        %90 = arith.select %82, %88, %89 : vector<1x1xi1>, vector<1x1xf32>
        %c0_51 = arith.constant 0 : index
        %c0_52 = arith.constant 0 : index
        %91 = vector.load %arg12[%c0_51, %c0_52] : memref<1x1xf32, #tpu.memory_space<vmem>>, vector<1x1xf32>
        %92 = arith.addf %91, %90 : vector<1x1xf32>
        %c0_53 = arith.constant 0 : index
        %c0_54 = arith.constant 0 : index
        %93 = vector.load %arg12[%c0_53, %c0_54] : memref<1x1xf32, #tpu.memory_space<vmem>>, vector<1x1xf32>
        tpu.vector_store %arg12[%c0_53, %c0_54], %92 {strides = array<i32>} : memref<1x1xf32, #tpu.memory_space<vmem>>, vector<1x1xf32>,
        %c0_55 = arith.constant 0 : index
        %c0_56 = arith.constant 0 : index
        %94 = vector.load %arg13[%c0_55, %c0_56] : memref<1x1xf32, #tpu.memory_space<vmem>>, vector<1x1xf32>
        %cst_57 = arith.constant 0.000000e+00 : f32
        %95 = vector.broadcast %cst_57 : f32 to vector<1x1xf32>
        %96 = arith.cmpf ogt, %80, %95 : vector<1x1xf32>
        %97 = arith.extui %96 : vector<1x1xi1> to vector<1x1xi32>
        %98 = arith.sitofp %97 : vector<1x1xi32> to vector<1x1xf32>
        %99 = arith.addf %94, %98 : vector<1x1xf32>
        %c0_58 = arith.constant 0 : index
        %c0_59 = arith.constant 0 : index
        %100 = vector.load %arg13[%c0_58, %c0_59] : memref<1x1xf32, #tpu.memory_space<vmem>>, vector<1x1xf32>
        tpu.vector_store %arg13[%c0_58, %c0_59], %99 {strides = array<i32>} : memref<1x1xf32, #tpu.memory_space<vmem>>, vector<1x1xf32>,
      } else {
      }
      %c3_i32 = arith.constant 3 : i32
      %75 = arith.cmpi eq, %arg1, %c3_i32 : i32
      %c0_i32_41 = arith.constant 0 : i32
      %76 = arith.cmpi eq, %arg2, %c0_i32_41 : i32
      %77 = arith.andi %75, %76 : i1
      %78 = arith.extui %77 : i1 to i32
      %c0_i32_42 = arith.constant 0 : i32
      %79 = arith.cmpi ne, %78, %c0_i32_42 : i32
      scf.if %79 {
        %c0_43 = arith.constant 0 : index
        %c0_44 = arith.constant 0 : index
        %80 = vector.load %arg11[%c0_43, %c0_44] : memref<1x1xf32, #tpu.memory_space<vmem>>, vector<1x1xf32>
        %cst_45 = arith.constant 0.333333343 : f32
        %81 = vector.broadcast %cst_45 : f32 to vector<1x1xf32>
        %82 = arith.mulf %80, %81 : vector<1x1xf32>
        %c0_46 = arith.constant 0 : index
        %c0_47 = arith.constant 0 : index
        %83 = vector.load %arg5[%c0_46, %c0_47] : memref<1x1xf32, #tpu.memory_space<vmem>>, vector<1x1xf32>
        tpu.vector_store %arg5[%c0_46, %c0_47], %82 {strides = array<i32>} : memref<1x1xf32, #tpu.memory_space<vmem>>, vector<1x1xf32>,
        %c0_48 = arith.constant 0 : index
        %c0_49 = arith.constant 0 : index
        %84 = vector.load %arg13[%c0_48, %c0_49] : memref<1x1xf32, #tpu.memory_space<vmem>>, vector<1x1xf32>
        %cst_50 = arith.constant 0.000000e+00 : f32
        %85 = vector.broadcast %cst_50 : f32 to vector<1x1xf32>
        %86 = arith.cmpf ogt, %84, %85 : vector<1x1xf32>
        %c0_51 = arith.constant 0 : index
        %c0_52 = arith.constant 0 : index
        %87 = vector.load %arg12[%c0_51, %c0_52] : memref<1x1xf32, #tpu.memory_space<vmem>>, vector<1x1xf32>
        %cst_53 = arith.constant 1.000000e+00 : f32
        %88 = vector.broadcast %cst_53 : f32 to vector<1x1xf32>
        %89 = arith.maximumf %84, %88 : vector<1x1xf32>
        %90 = arith.divf %87, %89 : vector<1x1xf32>
        %cst_54 = arith.constant 0.000000e+00 : f32
        %91 = vector.broadcast %cst_54 : f32 to vector<1x1xf32>
        %92 = arith.select %86, %90, %91 : vector<1x1xi1>, vector<1x1xf32>
        %c0_55 = arith.constant 0 : index
        %c0_56 = arith.constant 0 : index
        %93 = vector.load %arg6[%c0_55, %c0_56] : memref<1x1xf32, #tpu.memory_space<vmem>>, vector<1x1xf32>
        tpu.vector_store %arg6[%c0_55, %c0_56], %92 {strides = array<i32>} : memref<1x1xf32, #tpu.memory_space<vmem>>, vector<1x1xf32>,
      } else {
      }
    } else {
    }
    return
  }
  func.func @transform_0(%arg0: i32, %arg1: i32, %arg2: i32) -> (i32, i32, i32) {
    %c0_i32 = arith.constant 0 : i32
    %c0_i32_0 = arith.constant 0 : i32
    return %arg1, %c0_i32, %arg2 : i32, i32, i32
  }
  func.func @transform_1(%arg0: i32, %arg1: i32, %arg2: i32) -> (i32, i32, i32) {
    %c0_i32 = arith.constant 0 : i32
    %c0_i32_0 = arith.constant 0 : i32
    return %arg1, %arg2, %c0_i32 : i32, i32, i32
  }
  func.func @transform_2(%arg0: i32, %arg1: i32, %arg2: i32) -> (i32, i32) {
    %c0_i32 = arith.constant 0 : i32
    %c0_i32_0 = arith.constant 0 : i32
    %c0_i32_1 = arith.constant 0 : i32
    return %c0_i32, %c0_i32_0 : i32, i32
  }
  func.func @transform_3(%arg0: i32, %arg1: i32, %arg2: i32) -> (i32, i32) {
    %c0_i32 = arith.constant 0 : i32
    %c0_i32_0 = arith.constant 0 : i32
    %c0_i32_1 = arith.constant 0 : i32
    return %c0_i32, %c0_i32_0 : i32, i32
  }
}

</mosaic_0001>

<bundles_post_ra>
// kernel: tpu_custom_call.1
= control target key start
LH: loop header
LB: loop body
LE: loop exit
PB: predicated region body
PF: predicated region fallthrough
CT: control target
= control target key end

     0   :  { %9 = vsyncpa [#allocation14], 0  ;;  %s1649_s0 = inlined_call_operand.hbm [shape: s32[4,1,128], index: 0, kind: input, shape index: {}]   ;;  %s1650_s1 = inlined_call_operand.hbm [shape: f32[4,128,128], index: 1, kind: input, shape index: {}]   ;;  %s1651_s2 = inlined_call_operand.hbm [shape: f32[1,1], index: 2, kind: output, shape index: {0}]   ;;  %s1652_s3 = inlined_call_operand.hbm [shape: f32[1,1], index: 3, kind: output, shape index: {1}]  }
   0x1   :  { %11 = vsyncpa [#allocation14 + $0x1], 0 }
   0x2   :  { %12 = vsyncpa [#allocation17], 0 }
   0x3   :  { %14 = vsyncpa [#allocation17 + $0x1], 0 }
   0x4   :  { %15 = vsyncpa [#allocation15], 0 }
   0x5   :  { %16 = vsyncpa [#allocation20], 0  ;;  %s1274_s12 = smov 0   ;;  %s1276_s13 = smov 0  }
   0x6   :  { %s1278_s14 = smov 0   ;;  %s1280_s15 = smov 0  }
   0x7   :  { %s1282_s16 = smov 0   ;;  %s1284_s17 = smov 0  }
   0x8   :  { %s1286_s18 = smov 0   ;;  %s1288_s19 = smov 0  }
   0x9 LB: > { %s835_s20 = sadd.s32 4294967295, %s1238_s19   ;;  %s37_s21 = sadd.s32 1, %s1230_s17  ;;  %s1238_s19 = sphi %s1288_s19, %s22_s19   ;;  %s1234_s18 = sphi %s1286_s18, %s1668_s18   ;;  %s1230_s17 = sphi %s1284_s17, %s1667_s17   ;;  %s1226_s16 = sphi %s1282_s16, %s1666_s16   ;;  %s1222_s15 = sphi %s1280_s15, %s1665_s15   ;;  %s1218_s14 = sphi %s1278_s14, %s1664_s14   ;;  %s1214_s13 = sphi %s1276_s13, %s1663_s13   ;;  %s1210_s12 = sphi %s1274_s12, %s1662_s12  }
   0xa   : > { %p39_p0 = scmp.ge.s32.totalorder %s37_s21, 4  ;;  %s41_s22 = sadd.s32 1, %s1234_s18 }
   0xb   : > { %s50_s23 = sadd.s32 1, %s1218_s14  ;;  %p57_p1 = scmp.ne.s32.totalorder %s1218_s14, %s1214_s13 }
   0xc   : > { %s1670_s21 = smov (%p39_p0, %s37_s21), 0  ;;  %s1672_s22 = smov (!%p39_p0, %s41_s22), %s1234_s18 }
   0xd   : > { %s45_s24 = ssub.s32 %s1230_s17, %s1670_s21  ;;  %p58_p2 = scmp.eq.s32.totalorder %s1238_s19, 0 }
   0xe   : > { %p43_p3 = scmp.ge.s32.totalorder %s1672_s22, 2  ;;  %p48_p4 = scmp.eq.s32.totalorder %s45_s24, 0 }
   0xf   : > { %p1324_p5 = por %p58_p2, %p57_p1  ;;  %p63_p6 = scmp.ne.s32.totalorder %s1214_s13, %s1210_s12 }
  0x10   : > { %s1674_s22 = smov (%p43_p3, %s1672_s22), 0  ;;  %p64_p7 = scmp.eq.s32.totalorder %s835_s20, 0 }
  0x11   : > { %s1332_s26 = scalar_select %p48_p4, %s1218_s14, %s50_s23  }
  0x12   : > { %p955_p8 = scmp.lt.s32.totalorder %s1238_s19, 8  ;;  %s1338_s27 = sand.u32 1, %s1218_s14  }
  0x13   : > { %p1340_p9 = por %p64_p7, %p63_p6  ;;  %s838_s29 = sshll.u32 %s1230_s17, 4 }
  0x14   : > { %s1348_s5 = scalar_lea.hbm %s1649_s0, %s838_s29  ;;  %s160_s6 = scalar_lea.vmem [#allocation13], %s1338_s27 }
  0x15   : > { %s1655_s28 = scalar_select %p1340_p9, 1, 0 }
  0x16   : > { %s168_s7 = sshll.u32 %s160_s6, 4  ;;  %p1355_p10 = pnand %p955_p8, %p1324_p5  ;;  %s1351_s7 = int_to_ptr.vmem [resolvable:$true] %s168_s7 }
  0x17   : > { %s158_s9 = scalar_lea.sflag [#allocation14], %s1338_s27  ;;  %s1048_s10 = scalar_lea.hbm %s1348_s5, 16 }
  0x18   : > { %p1049_p13 = scmp.ne.s32.totalorder %s1348_s5, %s1048_s10  ;;  %p1050_p0 = pneg %p1355_p10 }
  0x19   : > { %s1053_s23 = scalar_lea.hbm %s1649_s0, 64  ;;  %p1054_p3 = scmp.lt.u32.totalorder %s1348_s5, %s1649_s0 }
  0x1a   : > { %p1051_p1 = pnand %p1050_p0, %p1049_p13  ;;  %p1055_p4 = scmp.lt.u32.totalorder %s1053_s23, %s1048_s10 }
  0x1b   : > { %p1057_p6 = scmp.lt.u32.totalorder %s1048_s10, %s1348_s5 }
  0x1c   : > { %p1052_p2 = pneg %p1051_p1  ;;  %p1056_p5 = por %p1055_p4, %p1054_p3 }
  0x1e   : > { %p1058_p7 = por %p1057_p6, %p1056_p5 }
  0x20   : > { %p1059_p8 = pnand %p1058_p7, %p1052_p2 }
  0x22   : > { %1062 = shalt.err (!%p1059_p8)
}
  0x23   : > { %s1063_s29 = scalar_lea.vmem %s1351_s7, 16  ;;  %s1240_s30 = smov [#allocation13]  }
  0x24   : > { %p1064_p13 = scmp.ne.s32.totalorder %s1351_s7, %s1063_s29  ;;  %s1068_s4 = sshll.u32 %s1240_s30, 4  ;;  %s1069_s4 = int_to_ptr.vmem [resolvable:$false] %s1068_s4 }
  0x25   : > { %s1070_s6 = scalar_lea.vmem %s1069_s4, 32  ;;  %p1071_p12 = scmp.lt.s32.totalorder %s1351_s7, %s1069_s4 }
  0x26   : > { %p1066_p1 = pnand %p1064_p13, %p1050_p0  ;;  %p1072_p3 = scmp.lt.s32.totalorder %s1070_s6, %s1063_s29 }
  0x28   : > { %p1067_p11 = pneg %p1066_p1  ;;  %p1073_p4 = por %p1072_p3, %p1071_p12 }
  0x2a   : > { %p1074_p5 = pnand %p1073_p4, %p1067_p11 }
  0x2c   : > { %1077 = shalt.err (!%p1074_p5)
}
  0x2d   : > { %951 = dma.hbm_to_vmem [thread:$0]  (!%p1355_p10), %s1348_s5, 16, %s1351_s7, %s158_s9  }
  0x2e   : > { %p1657_p2 = scmp.lt.s32.totalorder %s1238_s19, 9  ;;  %p1658_p6 = scmp.ge.s32.totalorder %s1238_s19, 1 }
  0x2f   : > { %s839_s11 = sshll.u32 %s1338_s27, 7  ;;  %s873_s12 = sshll.u32 %s1230_s17, 11 }
  0x30   : > { %p1391_p7 = pnand %p1658_p6, %p1657_p2  ;;  %s1400_s25 = scalar_lea.hbm %s1650_s1, %s873_s12 }
  0x31   : > { %s179_s29 = scalar_lea.vmem [#allocation16], %s839_s11  ;;  %s176_s5 = scalar_lea.sflag [#allocation17], %s1338_s27 }
  0x32   : > { %s188_s30 = sshll.u32 %s179_s29, 4  ;;  %s1078_s7 = scalar_lea.hbm %s1400_s25, 2048  ;;  %s1402_s30 = int_to_ptr.vmem [resolvable:$true] %s188_s30 }
  0x33   : > { %p1079_p11 = scmp.ne.s32.totalorder %s1400_s25, %s1078_s7  ;;  %s1083_s6 = scalar_lea.hbm %s1650_s1, 8192 }
  0x34   : > { %p1084_p13 = scmp.lt.u32.totalorder %s1400_s25, %s1650_s1  ;;  %p1085_p1 = scmp.lt.u32.totalorder %s1083_s6, %s1078_s7 }
  0x35   : > { %p1081_p12 = pnand %p1079_p11, %p1050_p0  ;;  %p1087_p4 = scmp.lt.u32.totalorder %s1078_s7, %s1400_s25 }
  0x36   : > { %p1086_p3 = por %p1085_p1, %p1084_p13 }
  0x37   : > { %p1082_p8 = pneg %p1081_p12 }
  0x38   : > { %p1088_p5 = por %p1087_p4, %p1086_p3 }
  0x3a   : > { %p1089_p2 = pnand %p1088_p5, %p1082_p8 }
  0x3c   : > { %1092 = shalt.err (!%p1089_p2)
}
  0x3d   : > { %s1093_s11 = scalar_lea.vmem %s1402_s30, 2048  ;;  %s1241_s24 = smov [#allocation16]  }
  0x3e   : > { %p1094_p6 = scmp.ne.s32.totalorder %s1402_s30, %s1093_s11  ;;  %s1098_s29 = sshll.u32 %s1241_s24, 4  ;;  %s1099_s29 = int_to_ptr.vmem [resolvable:$false] %s1098_s29 }
  0x3f   : > { %s1100_s9 = scalar_lea.vmem %s1099_s29, 4096  ;;  %p1101_p9 = scmp.lt.s32.totalorder %s1402_s30, %s1099_s29 }
  0x40   : > { %p1096_p11 = pnand %p1094_p6, %p1050_p0  ;;  %p1102_p13 = scmp.lt.s32.totalorder %s1100_s9, %s1093_s11 }
  0x42   : > { %p1097_p12 = pneg %p1096_p11  ;;  %p1103_p1 = por %p1102_p13, %p1101_p9 }
  0x44   : > { %p1104_p3 = pnand %p1103_p1, %p1097_p12 }
  0x46   : > { %1107 = shalt.err (!%p1104_p3)
}
  0x47   : > { %s1242_s7 = smov 128   ;;  %s1243_s4 = smov 8  }
  0x48   : > { %954 = dma.hbm_to_vmem [thread:$0]  (!%p1355_p10), %s1400_s25, 2048, %s1402_s30, %s176_s5, %s1242_s7, %s1242_s7, %s1243_s4  }
  0x49   : > { %200 = sbr.rel (%p1391_p7) target bundleno = 1085 (0x43d), region = 28  ;;  %s1433_s6 = sand.u32 (!%p1391_p7), 1, %s1214_s13  }
  0x4a   : > { %s203_s12 = scalar_lea.sflag (!%p1391_p7), [#allocation14], %s1433_s6  ;;  %s205_s23 = scalar_lea.vmem (!%p1391_p7), [#allocation13], %s1433_s6 }
  0x4b   : > { %p1660_p9 = scmp.ne.s32.totalorder (!%p1391_p7), %s1655_s28, 0 }
  0x50   : > { %1193 = dma.done.wait (%p1660_p9), %s203_s12, 16  }
  0x51   : > { %1195 = vsyncadd (%p1660_p9), %s203_s12, 4294967280  ;;  %s843_s27 = sshll.u32 %s1433_s6, 7  ;;  %s211_s8 = scalar_lea.sflag [#allocation17], %s1433_s6 }
  0x52   : > { %s1443_s10 = scalar_lea.vmem [#allocation16], %s843_s27 }
  0x53   : > { %1197 = dma.done.wait (%p1660_p9), %s211_s8, 2048  }
  0x54   : > { %1199 = vsyncadd (%p1660_p9), %s211_s8, 4294965248  ;;  %p238_p10 = scmp.eq.s32.totalorder %s1226_s16, 0  ;;  %p239_p0 = scmp.eq.s32.totalorder %s1222_s15, 0 }
  0x56   : > { %p240_p7 = pnand %p239_p0, %p238_p10 }
  0x57   : > { %vm249_vm0 = vcmask (!%p240_p7), 7168   ;;  %vm252_vm1 = vcmask (!%p240_p7), 0   ;;  %v1244_v0 = vmov (!%p240_p7), 0.0  }
  0x58   : > { %246 = sbr.rel (%p240_p7) target bundleno = 95 (0x5f), region = 40  ;;  %247 = vst [vmem:[#allocation4] sm:$0xff] (!%p240_p7), %v1244_v0  ;;  %248 = vst [vmem:[#allocation4 + $0x8] sm:$0xff] (!%p240_p7), %v1244_v0 }
  0x59   : > { %250 = vst.msk [vmem:[#allocation5] sm:$0xff] (!%p240_p7), %vm249_vm0, %v1244_v0  ;;  %251 = vst.msk [vmem:[#allocation5 + $0x8] sm:$0xff] (!%p240_p7), %vm249_vm0, %v1244_v0 }
  0x5a   : > { %253 = vst.msk [vmem:[#allocation6] sm:$0x1] (!%p240_p7), %vm252_vm1, %v1244_v0  ;;  %254 = vst.msk [vmem:[#allocation7] sm:$0x1] (!%p240_p7), %vm252_vm1, %v1244_v0 }
  0x5b   : > { %255 = vst.msk [vmem:[#allocation8] sm:$0x1] (!%p240_p7), %vm252_vm1, %v1244_v0  ;;  %256 = vst.msk [vmem:[#allocation18] sm:$0x1] (!%p240_p7), %vm252_vm1, %v1244_v0 }
  0x5c   : > { %257 = vst.msk [vmem:[#allocation19] sm:$0x1] (!%p240_p7), %vm252_vm1, %v1244_v0 }
  0x5f PF: > { %p258_p8 = scmp.eq.s32.totalorder %s1226_s16, 1 }
  0x61   : > { %p259_p4 = pnand %p258_p8, %p239_p0 }
  0x62   : > { %v265_v1 = vld [vmem:[#allocation5] sm:$0xff] (!%p259_p4)  ;;  %v266_v2 = vld [vmem:[#allocation5 + $0x8] sm:$0xff] (!%p259_p4)  ;;  %v1245_v3 = vmov (!%p259_p4), 0   ;;  %v273_v8 = vld [vmem:[#allocation4] sm:$0xff] (!%p259_p4) }
  0x63   : > { %264 = sbr.rel (%p259_p4) target bundleno = 247 (0xf7), region = 44  ;;  %1036 = vset.pattern.permute.xlu0 (!%p259_p4), %v1245_v3  ;;  %v267_v4 = vmax.f32 (!%p259_p4), %v265_v1, 1.0  ;;  %v268_v5 = vmax.f32 (!%p259_p4), %v266_v2, 1.0  ;;  %v274_v11 = vld [vmem:[#allocation4 + $0x8] sm:$0xff] (!%p259_p4) }
  0x65   : > { %1037 = vrcp.f32 (!%p259_p4), %v267_v4 }
  0x66   : > { %1039 = vrcp.f32 (!%p259_p4), %v268_v5 }
  0x6f   : > { %v1038_v6 = vpop.eup %1037 }
  0x70   : > { %277 = vperm.xlu0 %1036, %v1038_v6   ;;  %v1040_v7 = vpop.eup %1039 }
  0x74   : > { %282 = vperm.xlu0 %1036, %v1040_v7  }
  0xef   : > { %v278_v9 = vpop.permute.xlu0 %277 }
  0xf0   : > { %v285_v10 = vmul.f32 %v278_v9, %v273_v8 }
  0xf2   : > { %287 = vst [vmem:[#allocation4] sm:$0xff] %v285_v10 }
  0xf3   : > { %v283_v12 = vpop.permute.xlu0 %282 }
  0xf4   : > { %v286_v13 = vmul.f32 %v283_v12, %v274_v11 }
  0xf6   : > { %288 = vst [vmem:[#allocation4 + $0x8] sm:$0xff] %v286_v13 }
  0xf7 PF: > { %v307_v14 = vld [vmem:[%s1443_s10] sm:$0xff]  ;;  %v308_v15 = vld [vmem:[%s1443_s10 + $0x8] sm:$0xff]  ;;  %v309_v16 = vld [vmem:[%s1443_s10 + $0x10] sm:$0xff]  ;;  %v1246_v17 = vmov 0.0   ;;  %vm1247_vm2 = vmmov 0   ;;  %v290_v31 = vlaneseq  ;;  %s455_s28 = ssub.s32 0, %s1222_s15 }
  0xf8   : > { %914 = vmatprep.subr.bf16.mxu0 %v1246_v17  ;;  %v324_v18 = vpack.c.bf16 %v308_v15, %v307_v14  ;;  %894 = vmatprep.subr.bf16.mxu1 %v1246_v17  ;;  %v310_v19 = vld [vmem:[%s1443_s10 + $0x18] sm:$0xff]  ;;  %v311_v20 = vld [vmem:[%s1443_s10 + $0x20] sm:$0xff]  ;;  %v312_v21 = vld [vmem:[%s1443_s10 + $0x28] sm:$0xff]  ;;  %s853_s25 = smin.u32 %s1222_s15, %s455_s28  ;;  %p454_p5 = scmp.lt.s32.totalorder %s1222_s15, 0 }
  0xf9   : > { %v325_v22 = vpack.c.bf16 %v310_v19, %v309_v16  ;;  %v326_v23 = vpack.c.bf16 %v312_v21, %v311_v20  ;;  %v313_v24 = vld [vmem:[%s1443_s10 + $0x30] sm:$0xff]  ;;  %v314_v25 = vld [vmem:[%s1443_s10 + $0x38] sm:$0xff]  ;;  %930 = vmatprep.mubr.msk.bf16.mxu0 %vm1247_vm2, %v1246_v17  ;;  %910 = vmatprep.mubr.msk.bf16.mxu1 %vm1247_vm2, %v1246_v17  ;;  %v315_v38 = vld [vmem:[%s1443_s10 + $0x40] sm:$0xff]  ;;  %v1472_v43 = vshrl.u32 %v290_v31, 7  ;;  %s457_s30 = sand.u32 1, %s853_s25   ;;  %p856_p6 = scmp.ne.s32.totalorder %s1226_s16, 0 }
  0xfa   : > { %915 = vmatpush3.bf16.msra.mxu0 %v324_v18  ;;  %v332_v26 = vunpack.c.l.bf16 %v324_v18  ;;  %v333_v27 = vunpack.c.h.bf16 %v324_v18  ;;  %v327_v30 = vpack.c.bf16 %v314_v25, %v313_v24  ;;  %v316_v39 = vld [vmem:[%s1443_s10 + $0x48] sm:$0xff]  ;;  %v317_v48 = vld [vmem:[%s1443_s10 + $0x50] sm:$0xff]  ;;  %v318_v49 = vld [vmem:[%s1443_s10 + $0x58] sm:$0xff]  ;;  %s458_s5 = ssub.s32 0, %s457_s30  ;;  %p470_p11 = scmp.lt.s32.totalorder (!%p856_p6), %s1222_s15, 3 }
  0xfb   : > { %916 = vmatprep.subr.bf16.mxu0 %v1246_v17  ;;  %v334_v28 = vunpack.c.l.bf16 %v325_v22  ;;  %v335_v29 = vunpack.c.h.bf16 %v325_v22  ;;  %v336_v34 = vunpack.c.l.bf16 %v326_v23  ;;  %v337_v35 = vunpack.c.h.bf16 %v326_v23  ;;  %v846_v50 = vld [vmem:[%s205_s23] ss:$0 sm:$0xff]  ;;  %v319_v57 = vld [vmem:[%s1443_s10 + $0x60] sm:$0xff]  ;;  %v320_v58 = vld [vmem:[%s1443_s10 + $0x68] sm:$0xff]  ;;  %s1676_s5 = smov (!%p454_p5, %s458_s5), %s457_s30 }
  0xfc   : > { %v348_v32 = vsub.f32 %v307_v14, %v332_v26  ;;  %v349_v33 = vsub.f32 %v308_v15, %v333_v27  ;;  %v338_v41 = vunpack.c.l.bf16 %v327_v30  ;;  %v339_v42 = vunpack.c.h.bf16 %v327_v30  ;;  %v321_v3 = vld [vmem:[%s1443_s10 + $0x70] sm:$0xff]  ;;  %v322_v4 = vld [vmem:[%s1443_s10 + $0x78] sm:$0xff]  ;;  %p855_p2 = scmp.lt.s32.totalorder %s1676_s5, 0  ;;  %s464_s11 = sadd.s32 2, %s1676_s5 }
  0xfd   : > { %v350_v36 = vsub.f32 %v309_v16, %v334_v28  ;;  %v351_v37 = vsub.f32 %v310_v19, %v335_v29  ;;  %v352_v45 = vsub.f32 %v311_v20, %v336_v34  ;;  %v353_v46 = vsub.f32 %v312_v21, %v337_v35 }
  0xfe   : > { %v364_v40 = vpack.c.bf16 %v349_v33, %v348_v32  ;;  %917 = vmatpush3.bf16.msra.mxu0 %v325_v22  ;;  %v328_v47 = vpack.c.bf16 %v316_v39, %v315_v38  ;;  %v354_v51 = vsub.f32 %v313_v24, %v338_v41  ;;  %v355_v52 = vsub.f32 %v314_v25, %v339_v42  ;;  %s1678_s11 = smov (!%p855_p2, %s464_s11), %s1676_s5 }
  0xff   : > { %918 = vmatprep.subr.bf16.mxu0 %v1246_v17  ;;  %v365_v44 = vpack.c.bf16 %v351_v37, %v350_v36  ;;  %v329_v53 = vpack.c.bf16 %v318_v49, %v317_v48  ;;  %v366_v54 = vpack.c.bf16 %v353_v46, %v352_v45  ;;  %v292_v59 = vadd.s32 8, %v1472_v43  ;;  %s466_s24 = ssub.s32 1, %s1678_s11 }
 0x100   : > { %895 = vmatpush3.bf16.msra.mxu1 %v364_v40  ;;  %v340_v55 = vunpack.c.l.bf16 %v328_v47  ;;  %v341_v56 = vunpack.c.h.bf16 %v328_v47  ;;  %vm297_vm3 = vcmp.eq.s32.totalorder %v1472_v43, %v846_v50  ;;  %v367_v61 = vpack.c.bf16 %v355_v52, %v354_v51 }
 0x101   : > { %896 = vmatprep.subr.bf16.mxu1 %v1246_v17  ;;  %v847_v60 = vsel %vm297_vm3, 1.0, %v1246_v17  ;;  %v342_v62 = vunpack.c.l.bf16 %v329_v53  ;;  %v330_v63 = vpack.c.bf16 %v320_v58, %v319_v57  ;;  %vm298_vm4 = vcmp.eq.s32.totalorder %v292_v59, %v846_v50 }
 0x102   : > { %919 = vmatpush3.bf16.msra.mxu0 %v326_v23  ;;  %303 = vadd.xlane.f32.xlu0 %v847_v60  ;;  %v356_v0 = vsub.f32 %v315_v38, %v340_v55  ;;  %v357_v1 = vsub.f32 %v316_v39, %v341_v56  ;;  %v343_v2 = vunpack.c.h.bf16 %v329_v53  ;;  %v848_v5 = vsel %vm298_vm4, 1.0, %v1246_v17  ;;  %vm849_vm5 = vmpackc.low %vm298_vm4, %vm297_vm3 }
 0x103   : > { %920 = vmatprep.subr.bf16.mxu0 %v1246_v17  ;;  %v344_v6 = vunpack.c.l.bf16 %v330_v63  ;;  %v331_v7 = vpack.c.bf16 %v322_v4, %v321_v3  ;;  %v358_v9 = vsub.f32 %v317_v48, %v342_v62  ;;  %v345_v11 = vunpack.c.h.bf16 %v330_v63 }
 0x104   : > { %897 = vmatpush3.bf16.msra.mxu1 %v365_v44  ;;  %v368_v8 = vpack.c.bf16 %v357_v1, %v356_v0  ;;  %v359_v10 = vsub.f32 %v318_v49, %v343_v2  ;;  %v1248_v22 = vmov 1.0|1.0  }
 0x105   : > { %898 = vmatprep.subr.bf16.mxu1 %v1246_v17  ;;  %v346_v12 = vunpack.c.l.bf16 %v331_v7  ;;  %v360_v14 = vsub.f32 %v319_v57, %v344_v6  ;;  %v361_v15 = vsub.f32 %v320_v58, %v345_v11  ;;  %v347_v16 = vunpack.c.h.bf16 %v331_v7 }
 0x106   : > { %921 = vmatpush3.bf16.msra.mxu0 %v327_v30  ;;  %305 = vadd.xlane.f32.xlu0 %v848_v5  ;;  %v369_v13 = vpack.c.bf16 %v359_v10, %v358_v9 }
 0x107   : > { %922 = vmatprep.subr.bf16.mxu0 %v1246_v17  ;;  %v370_v18 = vpack.c.bf16 %v361_v15, %v360_v14  ;;  %v362_v19 = vsub.f32 %v321_v3, %v346_v12  ;;  %v363_v20 = vsub.f32 %v322_v4, %v347_v16 }
 0x108   : > { %899 = vmatpush3.bf16.msra.mxu1 %v366_v54 }
 0x109   : > { %900 = vmatprep.subr.bf16.mxu1 %v1246_v17  ;;  %v371_v21 = vpack.c.bf16 %v363_v20, %v362_v19 }
 0x10a   : > { %923 = vmatpush3.bf16.msra.mxu0 %v328_v47 }
 0x10b   : > { %924 = vmatprep.subr.bf16.mxu0 %v1246_v17 }
 0x10c   : > { %901 = vmatpush3.bf16.msra.mxu1 %v367_v61 }
 0x10d   : > { %902 = vmatprep.subr.bf16.mxu1 %v1246_v17 }
 0x10e   : > { %925 = vmatpush3.bf16.msra.mxu0 %v329_v53 }
 0x10f   : > { %926 = vmatprep.subr.bf16.mxu0 %v1246_v17 }
 0x110   : > { %903 = vmatpush3.bf16.msra.mxu1 %v368_v8 }
 0x111   : > { %904 = vmatprep.subr.bf16.mxu1 %v1246_v17 }
 0x112   : > { %927 = vmatpush3.bf16.msra.mxu0 %v330_v63 }
 0x113   : > { %928 = vmatprep.subr.bf16.mxu0 %v1246_v17 }
 0x114   : > { %905 = vmatpush3.bf16.msra.mxu1 %v369_v13 }
 0x115   : > { %906 = vmatprep.subr.bf16.mxu1 %v1246_v17 }
 0x116   : > { %929 = vmatpush3.bf16.msra.mxu0 %v331_v7 }
 0x118   : > { %907 = vmatpush3.bf16.msra.mxu1 %v370_v18 }
 0x119   : > { %908 = vmatprep.subr.bf16.mxu1 %v1246_v17  ;;  %931 = vmatmul.mubr.msk.bf16.vlgmr.msra.gmra.mrb[0].mxu0 %vm849_vm5, %v1248_v22 }
 0x11c   : > { %909 = vmatpush3.bf16.msra.mxu1 %v371_v21 }
 0x11f   : > { %911 = vmatmul.mubr.msk.bf16.vlgmr.msra.gmra.mrb[0].mxu1 %vm849_vm5, %v1248_v22 }
 0x18f   : > { %v1510_v23 = vpop.xlane.xlu0 %303 }
 0x193   : > { %v1512_v24 = vpop.xlane.xlu0 %305 }
 0x1ec   : > { %v447_v17 = vpop.f32.mrb[0].mxu0 }
 0x1ed   : > { %v932_v25 = vpop.f32.mrb[1].mxu0 }
 0x1ee   : > { %v450_v26 = vpop.f32.mrb[2].mxu0 }
 0x1ef   : > { %v933_v27 = vpop.f32.mrb[3].mxu0  ;;  %469 = sbr.rel (%p856_p6) target bundleno = 840 (0x348), region = 48 }
 0x1f2   : > { %v406_v28 = vpop.f32.mrb[0].mxu1 }
 0x1f3   : > { %v1514_v29 = vadd.f32 %v447_v17, %v406_v28  ;;  %v912_v30 = vpop.f32.mrb[1].mxu1 }
 0x1f4   : > { %v409_v31 = vpop.f32.mrb[2].mxu1 }
 0x1f5   : > { %v1516_v32 = vadd.f32 %v450_v26, %v409_v31  ;;  %v913_v33 = vpop.f32.mrb[3].mxu1 }
 0x1f6   : > { %474 = sbr.rel (!%p470_p11) target bundleno = 509 (0x1fd), region = 52  ;;  %s858_s29 = sshll.u32 (%p470_p11), %s1678_s11, 4  ;;  %vm480_vm6 = vcmask (%p470_p11), 7168  }
 0x1f7   : > { %s476_s9 = scalar_lea.vmem (%p470_p11), [#allocation2], %s858_s29  ;;  %s479_s7 = scalar_lea.vmem (%p470_p11), [#allocation3], %s858_s29 }
 0x1f8   : > { %477 = vst [vmem:[%s476_s9] sm:$0xff] (%p470_p11), %v1514_v29  ;;  %478 = vst [vmem:[%s476_s9 + $0x8] sm:$0xff] (%p470_p11), %v1516_v32 }
 0x1f9   : > { %481 = vst.msk [vmem:[%s479_s7] sm:$0xff] (%p470_p11), %vm480_vm6, %v1510_v23  ;;  %482 = vst.msk [vmem:[%s479_s7 + $0x8] sm:$0xff] (%p470_p11), %vm480_vm6, %v1512_v24 }
 0x1fd PF: > { %505 = sbr.rel (!%p470_p11) target bundleno = 516 (0x204), region = 60  ;;  %v506_v34 = vld [vmem:[#allocation4] sm:$0xff] (%p470_p11)  ;;  %s860_s4 = sshll.u32 (%p470_p11), %s1678_s11, 4  ;;  %v507_v35 = vld [vmem:[#allocation4 + $0x8] sm:$0xff] (%p470_p11)  ;;  %v516_v36 = vld [vmem:[#allocation5] sm:$0xff] (%p470_p11)  ;;  %vm523_vm7 = vcmask (%p470_p11), 7168  }
 0x1fe   : > { %v517_v37 = vld [vmem:[#allocation5 + $0x8] sm:$0xff] (%p470_p11)  ;;  %s509_s6 = scalar_lea.vmem (%p470_p11), [#allocation2], %s860_s4  ;;  %s518_s12 = scalar_lea.vmem (%p470_p11), [#allocation3], %s860_s4 }
 0x1ff   : > { %v510_v38 = vld [vmem:[%s509_s6] sm:$0xff] (%p470_p11)  ;;  %v511_v39 = vld [vmem:[%s509_s6 + $0x8] sm:$0xff] (%p470_p11) }
 0x200   : > { %v519_v40 = vld [vmem:[%s518_s12] sm:$0xff] (%p470_p11)  ;;  %v512_v41 = vadd.f32 (%p470_p11), %v510_v38, %v506_v34  ;;  %v513_v42 = vadd.f32 (%p470_p11), %v511_v39, %v507_v35  ;;  %v520_v44 = vld [vmem:[%s518_s12 + $0x8] sm:$0xff] (%p470_p11) }
 0x201   : > { %v521_v43 = vadd.f32 (%p470_p11), %v519_v40, %v516_v36  ;;  %v522_v45 = vadd.f32 (%p470_p11), %v520_v44, %v517_v37 }
 0x202   : > { %514 = vst [vmem:[#allocation4] sm:$0xff] (%p470_p11), %v512_v41  ;;  %515 = vst [vmem:[#allocation4 + $0x8] sm:$0xff] (%p470_p11), %v513_v42 }
 0x203   : > { %524 = vst.msk [vmem:[#allocation5] sm:$0xff] (%p470_p11), %vm523_vm7, %v521_v43  ;;  %525 = vst.msk [vmem:[#allocation5 + $0x8] sm:$0xff] (%p470_p11), %vm523_vm7, %v522_v45 }
 0x204 PF: > { %p861_p12 = scmp.ne.s32.totalorder %s1222_s15, 3 }
 0x205   : > { %vm540_vm8 = vcmask (!%p861_p12), 7168  }
 0x206   : > { %529 = sbr.rel (%p861_p12) target bundleno = 526 (0x20e), region = 64 }
 0x209   : > { %v530_v46 = vld [vmem:[#allocation4] sm:$0xff] (!%p861_p12)  ;;  %v531_v47 = vld [vmem:[#allocation4 + $0x8] sm:$0xff] (!%p861_p12) }
 0x20a   : > { %v536_v48 = vld [vmem:[#allocation5] sm:$0xff] (!%p861_p12)  ;;  %v532_v49 = vadd.f32 (!%p861_p12), %v530_v46, %v1514_v29  ;;  %v533_v50 = vadd.f32 (!%p861_p12), %v531_v47, %v1516_v32  ;;  %v537_v52 = vld [vmem:[#allocation5 + $0x8] sm:$0xff] (!%p861_p12) }
 0x20b   : > { %v538_v51 = vadd.f32 (!%p861_p12), %v536_v48, %v1510_v23  ;;  %v539_v53 = vadd.f32 (!%p861_p12), %v537_v52, %v1512_v24 }
 0x20c   : > { %534 = vst [vmem:[#allocation4] sm:$0xff] (!%p861_p12), %v532_v49  ;;  %535 = vst [vmem:[#allocation4 + $0x8] sm:$0xff] (!%p861_p12), %v533_v50 }
 0x20d   : > { %541 = vst.msk [vmem:[#allocation5] sm:$0xff] %vm540_vm8, %v538_v51  ;;  %542 = vst.msk [vmem:[#allocation5 + $0x8] sm:$0xff] %vm540_vm8, %v539_v53 }
 0x20e PF: > { %p862_p13 = scmp.le.s32.totalorder %s1222_s15, 0 }
 0x20f   : > { %s1534_s23 = sshll.u32 (!%p862_p13), %s466_s24, 4  ;;  %vm550_vm9 = vcmask (!%p862_p13), 0   ;;  %v1249_v54 = vmov (!%p862_p13), 0   ;;  %v1250_v55 = vmov (!%p862_p13), 0.0   ;;  %vm596_vm10 = vcmask (!%p862_p13), 7168  }
 0x210   : > { %546 = sbr.rel (%p862_p13) target bundleno = 840 (0x348), region = 68  ;;  %1041 = vset.pattern.permute.xlu0 (!%p862_p13), %v1249_v54  ;;  %552 = vst.msk [vmem:[#allocation10] sm:$0x1] (!%p862_p13), %vm550_vm9, %v1250_v55  ;;  %551 = vst.msk [vmem:[#allocation9] sm:$0x1] (!%p862_p13), %vm550_vm9, %v1250_v55  ;;  %s554_s27 = scalar_lea.vmem (!%p862_p13), [#allocation3], %s1534_s23 }
 0x211   : > { %v555_v56 = vld [vmem:[%s554_s27] sm:$0xff] (!%p862_p13)  ;;  %v556_v57 = vld [vmem:[%s554_s27 + $0x8] sm:$0xff] (!%p862_p13)  ;;  %s559_s8 = scalar_lea.vmem (!%p862_p13), [#allocation2], %s1534_s23 }
 0x212   : > { %v557_v58 = vmul.f32 (!%p862_p13), %v555_v56, %v1510_v23  ;;  %v558_v59 = vmul.f32 (!%p862_p13), %v556_v57, %v1512_v24  ;;  %v560_v7 = vld [vmem:[%s559_s8] sm:$0xff] (!%p862_p13)  ;;  %v561_v9 = vld [vmem:[%s559_s8 + $0x8] sm:$0xff] (!%p862_p13) }
 0x213   : > { %v562_v8 = vsub.f32 (!%p862_p13), %v1514_v29, %v560_v7  ;;  %v563_v11 = vsub.f32 (!%p862_p13), %v1516_v32, %v561_v9  ;;  %v619_v37 = vld [vmem:[#allocation6] sm:$0x1] (!%p862_p13) }
 0x214   : > { %569 = vperm.xlu0 (!%p862_p13), %1041, %v557_v58   ;;  %v597_v60 = vsel (!%p862_p13), %vm596_vm10, %v557_v58, 0.0  ;;  %v598_v61 = vsel (!%p862_p13), %vm596_vm10, %v558_v59, 0.0 }
 0x215   : > { %v599_v62 = vadd.f32 (!%p862_p13), %v598_v61, %v597_v60  ;;  %v565_v10 = vmul.f32 (!%p862_p13), %v562_v8, %v562_v8  ;;  %v566_v14 = vmul.f32 (!%p862_p13), %v563_v11, %v563_v11 }
 0x217   : > { %v600_v63 = vrot.slane %v599_v62, 4  ;;  %v593_v4 = vld [vmem:[#allocation10] sm:$0x1]  ;;  %v564_v30 = vld [vmem:[#allocation9] sm:$0x1] }
 0x218   : > { %574 = vperm.xlu0 %1041, %v558_v59  }
 0x219   : > { %v601_v0 = vadd.f32 %v600_v63, %v599_v62 }
 0x21b   : > { %v602_v1 = vrot.slane %v601_v0, 2 }
 0x21d   : > { %v603_v2 = vadd.f32 %v602_v1, %v601_v0 }
 0x21f   : > { %v604_v3 = vrot.slane %v603_v2, 1 }
 0x221   : > { %v605_v5 = vadd.f32 %v604_v3, %v603_v2 }
 0x223   : > { %v606_v6 = vadd.f32 %v605_v5, %v593_v4 }
 0x225   : > { %607 = vst.msk [vmem:[#allocation10] sm:$0x1] %vm550_vm9, %v606_v6 }
 0x22c   : > { %v611_v25 = vld [vmem:[#allocation10] sm:$0x1] }
 0x22d   : > { %v615_v27 = vmax.f32 %v611_v25, 1.0  ;;  %vm612_vm11 = vcmp.gt.f32.partialorder %v611_v25, 0.0 }
 0x22f   : > { %1042 = vrcp.f32 %v615_v27 }
 0x239   : > { %v1043_v34 = vpop.eup %1042 }
 0x293   : > { %v570_v12 = vpop.permute.xlu0 %569 }
 0x294   : > { %v577_v13 = vmul.f32 %v570_v12, %v565_v10 }
 0x296   : > { %579 = vadd.xlane.f32.xlu1 %v577_v13 }
 0x297   : > { %v575_v15 = vpop.permute.xlu0 %574 }
 0x298   : > { %v578_v16 = vmul.f32 %v575_v15, %v566_v14 }
 0x29a   : > { %581 = vadd.xlane.f32.xlu1 %v578_v16 }
 0x323   : > { %v580_v18 = vpop.xlane.xlu1 %579 }
 0x327   : > { %v582_v19 = vpop.xlane.xlu1 %581 }
 0x328   : > { %v583_v20 = vadd.f32 %v582_v19, %v580_v18 }
 0x32a   : > { %v584_v21 = vrot.slane %v583_v20, 4 }
 0x32c   : > { %v585_v22 = vadd.f32 %v584_v21, %v583_v20 }
 0x32e   : > { %v586_v17 = vrot.slane %v585_v22, 2 }
 0x330   : > { %v587_v26 = vadd.f32 %v586_v17, %v585_v22 }
 0x332   : > { %v588_v28 = vrot.slane %v587_v26, 1 }
 0x334   : > { %v589_v31 = vadd.f32 %v588_v28, %v587_v26 }
 0x336   : > { %v590_v33 = vadd.f32 %v589_v31, %v564_v30 }
 0x338   : > { %592 = vst.msk [vmem:[#allocation9] sm:$0x1] %vm550_vm9, %v590_v33 }
 0x33f   : > { %v613_v35 = vld [vmem:[#allocation9] sm:$0x1] }
 0x340   : > { %v614_v36 = vmul.f32 0.03125, %v613_v35 }
 0x342   : > { %v617_v38 = vmul.f32 %v1043_v34, %v614_v36 }
 0x344   : > { %v618_v39 = vsel %vm612_vm11, %v617_v38, 0.0 }
 0x345   : > { %v620_v40 = vadd.f32 %v619_v37, %v618_v39 }
 0x347   : > { %621 = vst.msk [vmem:[#allocation6] sm:$0x1] %vm550_vm9, %v620_v40 }
 0x348 PF: > { %p864_p1 = scmp.ne.s32.totalorder %s1226_s16, 1 }
 0x349   : > { %v631_v41 = vld [vmem:[#allocation4] sm:$0xff] (!%p864_p1)  ;;  %v632_v42 = vld [vmem:[#allocation4 + $0x8] sm:$0xff] (!%p864_p1)  ;;  %v657_v49 = vadd.f32 (!%p864_p1), %v1512_v24, %v1510_v23  ;;  %vm628_vm12 = vcmask (!%p864_p1), 0   ;;  %v1251_v53 = vmov (!%p864_p1), 0.0   ;;  %p685_p3 = scmp.eq.s32.totalorder (!%p864_p1), %s1222_s15, 3 }
 0x34a   : > { %624 = sbr.rel (%p864_p1) target bundleno = 1037 (0x40d), region = 80  ;;  %v633_v43 = vsub.f32 (!%p864_p1), %v1514_v29, %v631_v41  ;;  %v634_v44 = vsub.f32 (!%p864_p1), %v1516_v32, %v632_v42  ;;  %629 = vst.msk [vmem:[#allocation11] sm:$0x1] (!%p864_p1), %vm628_vm12, %v1251_v53  ;;  %630 = vst.msk [vmem:[#allocation12] sm:$0x1] (!%p864_p1), %vm628_vm12, %v1251_v53 }
 0x34b   : > { %v658_v50 = vrot.slane (!%p864_p1), %v657_v49, 4  ;;  %v677_v10 = vld [vmem:[#allocation7] sm:$0x1] (!%p864_p1) }
 0x34c   : > { %v636_v45 = vmul.f32 (!%p864_p1), %v633_v43, %v633_v43  ;;  %v637_v46 = vmul.f32 (!%p864_p1), %v634_v44, %v634_v44 }
 0x34d   : > { %v659_v51 = vadd.f32 (!%p864_p1), %v658_v50, %v657_v49 }
 0x34e   : > { %v638_v47 = vmul.f32 (!%p864_p1), %v636_v45, %v1510_v23  ;;  %v639_v48 = vmul.f32 (!%p864_p1), %v637_v46, %v1512_v24  ;;  %v680_v23 = vld [vmem:[#allocation8] sm:$0x1] (!%p864_p1) }
 0x34f   : > { %v660_v52 = vrot.slane (!%p864_p1), %v659_v51, 2 }
 0x350   : > { %640 = vadd.xlane.f32.xlu0 (!%p864_p1), %v638_v47 }
 0x351   : > { %v661_v29 = vadd.f32 %v660_v52, %v659_v51  ;;  %v654_v55 = vld [vmem:[#allocation12] sm:$0x1]  ;;  %v635_v4 = vld [vmem:[#allocation11] sm:$0x1]  ;;  %v690_v14 = vld [vmem:[#allocation6] sm:$0x1] (%p685_p3) }
 0x352   : > { %v691_v16 = vmul.f32 (%p685_p3), 0.33333334, %v690_v14 }
 0x353   : > { %v662_v32 = vrot.slane %v661_v29, 1 }
 0x354   : > { %642 = vadd.xlane.f32.xlu0 %v639_v48  ;;  %692 = vst.msk [vmem:[#allocation18] sm:$0x1] (%p685_p3), %vm628_vm12, %v691_v16 }
 0x355   : > { %v663_v54 = vadd.f32 %v662_v32, %v661_v29 }
 0x357   : > { %v664_v56 = vadd.f32 %v663_v54, %v654_v55 }
 0x359   : > { %665 = vst.msk [vmem:[#allocation12] sm:$0x1] %vm628_vm12, %v664_v56 }
 0x360   : > { %v669_v57 = vld [vmem:[#allocation12] sm:$0x1] }
 0x361   : > { %vm670_vm13 = vcmp.gt.f32.partialorder %v669_v57, 0.0  ;;  %v673_v2 = vmax.f32 %v669_v57, 1.0 }
 0x362   : > { %v865_v24 = vsel %vm670_vm13, 1.0, %v1251_v53 }
 0x363   : > { %v683_v58 = vadd.f32 %v865_v24, %v680_v23  ;;  %1044 = vrcp.f32 %v673_v2 }
 0x365   : > { %684 = vst.msk [vmem:[#allocation8] sm:$0x1] %vm628_vm12, %v683_v58 }
 0x36c   : > { %v693_v15 = vld [vmem:[#allocation8] sm:$0x1] (%p685_p3) }
 0x36d   : > { %v1045_v7 = vpop.eup %1044  ;;  %v696_v18 = vmax.f32 (%p685_p3), %v693_v15, 1.0  ;;  %vm694_vm14 = vcmp.gt.f32.partialorder (%p685_p3), %v693_v15, 0.0 }
 0x36f   : > { %1046 = vrcp.f32 (%p685_p3), %v696_v18 }
 0x379   : > { %v1047_v20 = vpop.eup (%p685_p3), %1046 }
 0x3dd   : > { %v641_v59 = vpop.xlane.xlu0 %640 }
 0x3e1   : > { %v643_v60 = vpop.xlane.xlu0 %642 }
 0x3e2   : > { %v644_v61 = vadd.f32 %v643_v60, %v641_v59 }
 0x3e4   : > { %v645_v62 = vrot.slane %v644_v61, 4 }
 0x3e6   : > { %v646_v63 = vadd.f32 %v645_v62, %v644_v61 }
 0x3e8   : > { %v647_v0 = vrot.slane %v646_v63, 2 }
 0x3ea   : > { %v648_v1 = vadd.f32 %v647_v0, %v646_v63 }
 0x3ec   : > { %v649_v3 = vrot.slane %v648_v1, 1 }
 0x3ee   : > { %v650_v5 = vadd.f32 %v649_v3, %v648_v1 }
 0x3f0   : > { %v651_v6 = vadd.f32 %v650_v5, %v635_v4 }
 0x3f2   : > { %653 = vst.msk [vmem:[#allocation11] sm:$0x1] %vm628_vm12, %v651_v6 }
 0x3f9   : > { %v671_v8 = vld [vmem:[#allocation11] sm:$0x1] }
 0x3fa   : > { %v672_v9 = vmul.f32 0.03125, %v671_v8 }
 0x3fb   : > { %689 = sbr.rel (!%p685_p3) target bundleno = 1037 (0x40d), region = 92 }
 0x3fc   : > { %v675_v11 = vmul.f32 %v1045_v7, %v672_v9 }
 0x3fe   : > { %v676_v12 = vsel %vm670_vm13, %v675_v11, 0.0 }
 0x3ff   : > { %v678_v13 = vadd.f32 %v677_v10, %v676_v12 }
 0x401   : > { %679 = vst.msk [vmem:[#allocation7] sm:$0x1] %vm628_vm12, %v678_v13 }
 0x408   : > { %v695_v19 = vld [vmem:[#allocation7] sm:$0x1] }
 0x409   : > { %v698_v21 = vmul.f32 %v1047_v20, %v695_v19 }
 0x40b   : > { %v699_v22 = vsel %vm694_vm14, %v698_v21, 0.0 }
 0x40c   : > { %700 = vst.msk [vmem:[#allocation19] sm:$0x1] %vm628_vm12, %v699_v22 }
 0x40d PF: > { %p1569_p9 = scmp.eq.s32.totalorder %s835_s20, 7  ;;  %s1252_s16 = smov [#allocation18]  }
 0x40e   : > { %s708_s10 = sshll.u32 %s1252_s16, 4  ;;  %s1253_s28 = smov [#allocation19]   ;;  %s709_s10 = int_to_ptr.vmem [resolvable:$true] %s708_s10 }
 0x40f   : > { %s719_s25 = sshll.u32 %s1253_s28, 4  ;;  %s1108_s30 = scalar_lea.vmem %s709_s10, 16  ;;  %s1573_s25 = int_to_ptr.vmem [resolvable:$true] %s719_s25 }
 0x410   : > { %p1109_p10 = scmp.ne.s32.totalorder %s709_s10, %s1108_s30  ;;  %s1114_s5 = scalar_lea.vmem %s709_s10, 32 }
 0x411   : > { %p1115_p8 = scmp.lt.s32.totalorder %s709_s10, %s709_s10  ;;  %p1116_p4 = scmp.lt.s32.totalorder %s1114_s5, %s1108_s30 }
 0x412   : > { %p1110_p0 = pnand %p1109_p10, %p1569_p9 }
 0x413   : > { %p1117_p5 = por %p1116_p4, %p1115_p8 }
 0x414   : > { %p1111_p7 = pneg %p1110_p0 }
 0x416   : > { %p1118_p2 = pnand %p1117_p5, %p1111_p7 }
 0x418   : > { %1121 = shalt.err (!%p1118_p2)
}
 0x419   : > { %s1122_s24 = scalar_lea.hbm %s1651_s2, 16 }
 0x41a   : > { %p1123_p6 = scmp.ne.s32.totalorder %s1651_s2, %s1122_s24  ;;  %p1128_p13 = scmp.lt.u32.totalorder %s1122_s24, %s1651_s2 }
 0x41c   : > { %p1124_p11 = pnand %p1123_p6, %p1569_p9 }
 0x41e   : > { %p1125_p12 = pneg %p1124_p11 }
 0x420   : > { %p1130_p1 = pnand %p1128_p13, %p1125_p12 }
 0x422   : > { %1133 = shalt.err (!%p1130_p1)
}
 0x423   : > { %941 = dma.vmem_to_hbm [thread:$0]  (%p1569_p9), %s709_s10, 16, %s1651_s2, [#allocation15]  }
 0x424   : > { %s1134_s23 = scalar_lea.vmem %s1573_s25, 16  ;;  %s1140_s27 = scalar_lea.vmem %s1573_s25, 32 }
 0x425   : > { %p1135_p3 = scmp.ne.s32.totalorder %s1573_s25, %s1134_s23  ;;  %p1141_p7 = scmp.lt.s32.totalorder %s1573_s25, %s1573_s25 }
 0x426   : > { %p1142_p8 = scmp.lt.s32.totalorder %s1140_s27, %s1134_s23 }
 0x427   : > { %p1136_p10 = pnand %p1135_p3, %p1569_p9 }
 0x428   : > { %p1143_p4 = por %p1142_p8, %p1141_p7 }
 0x429   : > { %p1137_p0 = pneg %p1136_p10 }
 0x42b   : > { %p1144_p5 = pnand %p1143_p4, %p1137_p0 }
 0x42d   : > { %1147 = shalt.err (!%p1144_p5)
}
 0x42e   : > { %s1148_s28 = scalar_lea.hbm %s1652_s3, 16 }
 0x42f   : > { %p1149_p2 = scmp.ne.s32.totalorder %s1652_s3, %s1148_s28  ;;  %p1154_p12 = scmp.lt.u32.totalorder %s1148_s28, %s1652_s3 }
 0x431   : > { %p1150_p6 = pnand %p1149_p2, %p1569_p9 }
 0x433   : > { %p1151_p11 = pneg %p1150_p6 }
 0x435   : > { %p1156_p13 = pnand %p1154_p12, %p1151_p11 }
 0x437   : > { %1159 = shalt.err (!%p1156_p13)
}
 0x438   : > { %943 = dma.vmem_to_hbm [thread:$0]  (%p1569_p9), %s1573_s25, 16, %s1652_s3, [#allocation20]  }
 0x439   : > { %1201 = dma.done.wait (%p1569_p9), [#allocation15], 16  }
 0x43a   : > { %1203 = vsyncadd (%p1569_p9), [#allocation15], 4294967280 }
 0x43b   : > { %1205 = dma.done.wait (%p1569_p9), [#allocation20], 16  }
 0x43c   : > { %1207 = vsyncadd (%p1569_p9), [#allocation20], 4294967280 }
 0x43d PF: > { %s22_s19 = sadd.s32 1, %s1238_s19   ;;  %s1662_s12 = smov %s1214_s13 }
 0x43e   : > { %p19_p1 = scmp.ge.s32.totalorder %s22_s19, 10   ;;  %s1663_s13 = smov %s1218_s14 }
 0x43f   : > { %s1664_s14 = smov %s1332_s26  ;;  %s1665_s15 = smov %s1230_s17 }
 0x440   : > { %s1666_s16 = smov %s1234_s18  ;;  %s1667_s17 = smov %s1670_s21 }
 0x441   : > { %s1668_s18 = smov %s1674_s22  ;;  %21 = sbr.rel (!%p19_p1) target bundleno = 9 (0x9), region = 150 }
 0x448   :  { %736 = vsyncpa [#allocation14], 1 }
 0x449   :  { %738 = vsyncpa [#allocation14 + $0x1], 1 }
 0x44a   :  { %739 = vsyncpa [#allocation17], 1 }
 0x44b   :  { %741 = vsyncpa [#allocation17 + $0x1], 1 }
 0x44c   :  { %742 = vsyncpa [#allocation15], 1 }
 0x44d   :  { %744 = vsyncpa [#allocation15 + $0x1], 1 }
 0x44e   :  { %745 = vsyncpa [#allocation20], 1 }

</bundles_post_ra>
